<compile_context>
chip_gen: v7x
topology: tpu7x:2x2x1
jax: 0.10.0
libtpu: 0.0.40
codegen_flags: <defaults>
</compile_context>

<pallas_src>
import math
from functools import partial

import jax
import jax.numpy as jnp
import numpy as np
from jax.experimental import pallas as pl
from jax.experimental.pallas import tpu as pltpu

LANE = 128


# ----------------------------------------------------------------------------
# beta schedules (numpy, identical to the PyTorch reference)
# ----------------------------------------------------------------------------
def cosine_beta_schedule(timesteps, s=0.008):
    steps = timesteps + 1
    x = np.linspace(0, steps, steps)
    alphas_cumprod = np.cos((x / steps + s) / (1 + s) * np.pi * 0.5) ** 2
    alphas_cumprod = alphas_cumprod / alphas_cumprod[0]
    betas = 1 - alphas_cumprod[1:] / alphas_cumprod[:-1]
    return np.clip(betas, a_min=0, a_max=0.999)


def linear_beta_schedule(timesteps, max_beta=0.01):
    return np.linspace(0.0001, max_beta, timesteps)


# ----------------------------------------------------------------------------
# Fused Pallas kernel: norm_spec + q_sample + DiffNet (all layers) + L1 loss
# ----------------------------------------------------------------------------
def _fused_diff_loss_kernel(
    # SMEM
    coef_ref,                                   # [B, 2]
    # per-batch VMEM blocks
    dec_ref, sty_ref, tgt_ref,                  # [1,H,T], [1,H,1], [1,1,T]
    mel_ref, sscale_ref, soff_ref, noise_ref,   # [1,M,T], [M,1], [M,1], [1,M,T]
    dstep_ref,                                  # [1,1,C,1]
    # weights
    w_in_ref, b_in_ref,                         # [C,M], [C,1]
    wcomb_ref, bcomb_ref,                       # [1,2C,3C+H], [1,2C,1]
    wres_ref, bres_ref,                         # [1,2C,C], [1,2C,1]
    wskip_ref, bskip_ref,                       # [C,C] (pre-scaled by 1/sqrt(L)), [C,1]
    wout_ref, bout_ref,                         # [M,C], [M,1]
    # output
    loss_ref,                                   # [1,1,T]  per-batch partial sums
    # VMEM scratch carried across the layer grid axis
    stk_sc, x_sc, skip_sc,                      # [3C+H,T], [C,T], [C,T]
    *, C, M, T, T_valid, L, dil_cycle):
    b = pl.program_id(0)
    l = pl.program_id(1)
    inv_sqrt2 = np.float32(1.0 / math.sqrt(2.0))

    @pl.when(l == 0)
    def _init():
        # conditioner rows of the stacked operand, built once per batch:
        # (decoder_inp + style_embed) * tgt_nonpadding  -> [H, T]
        stk_sc[3 * C:, :] = (dec_ref[0] + sty_ref[0]) * tgt_ref[0]
        # norm_spec (folded to scale/offset) + q_sample + input 1x1 conv + ReLU
        xn = mel_ref[0] * sscale_ref[...] + soff_ref[...]                # [M, T]
        x_noisy = coef_ref[b, 0] * xn + coef_ref[b, 1] * noise_ref[0]    # [M, T]
        x0 = jnp.dot(w_in_ref[...], x_noisy,
                     preferred_element_type=jnp.float32) + b_in_ref[...]
        x_sc[...] = jnp.maximum(x0, 0.0)
        skip_sc[...] = jnp.zeros_like(skip_sc)

    x = x_sc[...]
    y = x + dstep_ref[0, 0]                                              # [C, T]
    lane = jax.lax.broadcasted_iota(jnp.int32, (C, T), 1)
    if T_valid < T:
        # zero the lane-padding so the dilated taps see PyTorch Conv1d
        # zero-padding at the true sequence edge.
        y = jnp.where(lane < T_valid, y, 0.0)

    # centre tap
    stk_sc[C:2 * C, :] = y

    # dilated taps y[t-d], y[t+d] via XLU roll + static edge masks; only the
    # branch matching this layer's dilation phase runs (2 rolls per layer).
    phase = l % len(dil_cycle)

    def _tap_writer(d):
        def _w():
            stk_sc[0:C, :] = jnp.where(lane >= d,
                                       pltpu.roll(y, d, axis=1), 0.0)       # y[t-d]
            stk_sc[2 * C:3 * C, :] = jnp.where(lane < T - d,
                                               pltpu.roll(y, T - d, axis=1),
                                               0.0)                          # y[t+d]
        return _w

    for i, d in enumerate(dil_cycle):
        pl.when(phase == i)(_tap_writer(d))

    # dilated k=3 conv + conditioner 1x1 as ONE wide-K MXU matmul
    z = jnp.dot(wcomb_ref[0], stk_sc[...],
                preferred_element_type=jnp.float32) + bcomb_ref[0]       # [2C, T]
    g = jax.nn.sigmoid(z[:C, :]) * jnp.tanh(z[C:, :])                    # [C, T]
    out = jnp.dot(wres_ref[0], g,
                  preferred_element_type=jnp.float32) + bres_ref[0]      # [2C, T]
    x_sc[...] = (x + out[:C, :]) * inv_sqrt2
    skip_sc[...] = skip_sc[...] + out[C:, :]

    @pl.when(l == L - 1)
    def _final():
        # 1/sqrt(L) is folded into wskip_ref in the wrapper
        h = jnp.dot(wskip_ref[...], skip_sc[...],
                    preferred_element_type=jnp.float32) + bskip_ref[...]
        h = jnp.maximum(h, 0.0)
        x_recon = jnp.dot(wout_ref[...], h,
                          preferred_element_type=jnp.float32) + bout_ref[...]  # [M, T]
        diff = jnp.abs(noise_ref[0] - x_recon)
        if T_valid < T:
            lane_m = jax.lax.broadcasted_iota(jnp.int32, (M, T), 1)
            diff = jnp.where(lane_m < T_valid, diff, 0.0)
        loss_ref[0] = jnp.sum(diff, axis=0, keepdims=True)               # [1, T]


# ----------------------------------------------------------------------------
# GaussianDiffusion (training branch) in JAX + Pallas
# ----------------------------------------------------------------------------
class GaussianDiffusionPallas:
    def __init__(self, dict_size, hparams, param_key):
        self.hparams = hparams
        M = hparams['audio_num_mel_bins']
        H = hparams['hidden_size']
        C = hparams['residual_channels']
        L = hparams['residual_layers']
        cycle = hparams['dilation_cycle_length']
        self.mel_bins = M
        self.hidden = H
        self.res_channels = C
        self.num_layers = L
        self.dil_cycle = tuple(2 ** i for i in range(cycle))
        self.dilations = [2 ** (i % cycle) for i in range(L)]

        # --- diffusion schedule buffers (float32, exactly as PyTorch) ---
        timesteps = hparams['timesteps']
        if hparams['schedule_type'] == 'linear':
            betas = linear_beta_schedule(timesteps, hparams['max_beta'])
        else:
            betas = cosine_beta_schedule(timesteps)
        alphas = 1.0 - betas
        alphas_cumprod = np.cumprod(alphas, axis=0)
        self.num_timesteps = int(betas.shape[0])
        self.K_step = hparams['K_step']
        self.loss_type = hparams['diff_loss_type']
        self.sqrt_alphas_cumprod = jnp.asarray(np.sqrt(alphas_cumprod), jnp.float32)
        self.sqrt_one_minus_alphas_cumprod = jnp.asarray(
            np.sqrt(1.0 - alphas_cumprod), jnp.float32)

        spec_min = np.asarray(hparams['spec_min'], np.float32)[:hparams['keep_bins']]
        spec_max = np.asarray(hparams['spec_max'], np.float32)[:hparams['keep_bins']]
        self.spec_min = jnp.asarray(spec_min)[None, :]      # [1, M] (reference layout)
        self.spec_max = jnp.asarray(spec_max)[None, :]
        # norm_spec folded to a single scale/offset (no in-kernel divide)
        rng_inv = 1.0 / (spec_max - spec_min)
        self.spec_scale_c = jnp.asarray(2.0 * rng_inv, jnp.float32)[:, None]          # [M,1]
        self.spec_off_c = jnp.asarray(-2.0 * spec_min * rng_inv - 1.0,
                                      jnp.float32)[:, None]                           # [M,1]

        # --- deterministic synthetic parameters (fold_in: cannot run out) ---
        counter = [0]

        def init(shape, scale=0.1):
            counter[0] += 1
            k = jax.random.fold_in(param_key, counter[0])
            return jax.random.normal(k, shape, dtype=jnp.float32) * scale

        # fs2 stand-in: token / speaker embeddings.
        # TODO(synk): the full FastSpeech2Orig aux model (transformer encoder,
        # duration / pitch / energy predictors) has no compact Pallas
        # equivalent; a deterministic embedding encoder stand-in is used and
        # the provided mel2ph is taken as the length-regulation map.
        self.token_emb = init((dict_size, H), 0.3)
        self.spk_emb = init((hparams['num_spk'], H), 0.3)

        # DiffNet parameters (raw, layer-major; reference path uses these)
        self.w_in = init((C, M));          self.b_in = init((C,), 0.05)
        self.mlp_w1 = init((4 * C, C));    self.mlp_b1 = init((4 * C,), 0.05)
        self.mlp_w2 = init((C, 4 * C));    self.mlp_b2 = init((C,), 0.05)
        self.w_skip = init((C, C));        self.b_skip = init((C,), 0.05)
        self.w_out = init((M, C));         self.b_out = init((M,), 0.05)
        self.wd = init((L, 3, 2 * C, C));  self.bd = init((L, 2 * C), 0.05)
        self.wc = init((L, 2 * C, H));     self.bc = init((L, 2 * C), 0.05)
        self.wo = init((L, 2 * C, C));     self.bo = init((L, 2 * C), 0.05)
        self.dproj_w = init((L, C, C));    self.dproj_b = init((L, C), 0.05)

        # stacked / column forms used by the fused kernel
        self.w_comb = jnp.concatenate(
            [self.wd[:, 0], self.wd[:, 1], self.wd[:, 2], self.wc], axis=-1)  # [L,2C,3C+H]
        self.b_comb = (self.bd + self.bc)[..., None]                           # [L,2C,1]
        self.bo_c = self.bo[..., None]
        self.b_in_c = self.b_in[:, None]
        self.b_skip_c = self.b_skip[:, None]
        self.b_out_c = self.b_out[:, None]
        self.w_skip_scaled = self.w_skip * np.float32(1.0 / math.sqrt(L))

    # -------------------- diffusion-step embedding (tiny, plain JAX) --------
    def _step_projections(self, t):
        C = self.res_channels
        half = C // 2
        scale = math.log(10000.0) / (half - 1)
        freqs = jnp.exp(jnp.arange(half, dtype=jnp.float32) * -scale)
        emb = t.astype(jnp.float32)[:, None] * freqs[None, :]
        emb = jnp.concatenate([jnp.sin(emb), jnp.cos(emb)], axis=-1)     # [B, C]
        h = emb @ self.mlp_w1.T + self.mlp_b1
        h = h * jnp.tanh(jax.nn.softplus(h))                             # Mish
        step = h @ self.mlp_w2.T + self.mlp_b2                           # [B, C]
        dstep = jnp.einsum('bc,lkc->blk', step, self.dproj_w) + self.dproj_b[None]
        return dstep[..., None]                                          # [B, L, C, 1]

    # -------------------- fused training loss (one pallas_call) -------------
    def _fused_diff_loss(self, coef, dec_t, sty_c, tgt_r, mel_mt, noise, dstep,
                         T_valid):
        B, H, T_pad = dec_t.shape
        M = self.mel_bins
        C = self.res_channels
        L = self.num_layers
        K = 3 * C + H
        kern = partial(_fused_diff_loss_kernel, C=C, M=M, T=T_pad,
                       T_valid=T_valid, L=L, dil_cycle=self.dil_cycle)
        loss_parts = pl.pallas_call(
            kern,
            out_shape=jax.ShapeDtypeStruct((B, 1, T_pad), jnp.float32),
            grid=(B, L),
            in_specs=[
                pl.BlockSpec(memory_space=pltpu.MemorySpace.SMEM),        # coef [B,2]
                pl.BlockSpec((1, H, T_pad), lambda b, l: (b, 0, 0)),      # dec_t
                pl.BlockSpec((1, H, 1), lambda b, l: (b, 0, 0)),          # style
                pl.BlockSpec((1, 1, T_pad), lambda b, l: (b, 0, 0)),      # tgt mask
                pl.BlockSpec((1, M, T_pad), lambda b, l: (b, 0, 0)),      # ref mel
                pl.BlockSpec((M, 1), lambda b, l: (0, 0)),                # spec scale
                pl.BlockSpec((M, 1), lambda b, l: (0, 0)),                # spec offset
                pl.BlockSpec((1, M, T_pad), lambda b, l: (b, 0, 0)),      # noise
                pl.BlockSpec((1, 1, C, 1), lambda b, l: (b, l, 0, 0)),    # dstep
                pl.BlockSpec((C, M), lambda b, l: (0, 0)),                # w_in
                pl.BlockSpec((C, 1), lambda b, l: (0, 0)),                # b_in
                pl.BlockSpec((1, 2 * C, K), lambda b, l: (l, 0, 0)),      # w_comb
                pl.BlockSpec((1, 2 * C, 1), lambda b, l: (l, 0, 0)),      # b_comb
                pl.BlockSpec((1, 2 * C, C), lambda b, l: (l, 0, 0)),      # wo
                pl.BlockSpec((1, 2 * C, 1), lambda b, l: (l, 0, 0)),      # bo
                pl.BlockSpec((C, C), lambda b, l: (0, 0)),                # w_skip (scaled)
                pl.BlockSpec((C, 1), lambda b, l: (0, 0)),                # b_skip
                pl.BlockSpec((M, C), lambda b, l: (0, 0)),                # w_out
                pl.BlockSpec((M, 1), lambda b, l: (0, 0)),                # b_out
            ],
            out_specs=pl.BlockSpec((1, 1, T_pad), lambda b, l: (b, 0, 0)),
            scratch_shapes=[pltpu.VMEM((3 * C + H, T_pad), jnp.float32),
                            pltpu.VMEM((C, T_pad), jnp.float32),
                            pltpu.VMEM((C, T_pad), jnp.float32)],
            compiler_params=pltpu.CompilerParams(
                dimension_semantics=("parallel", "arbitrary")),
        )(coef, dec_t, sty_c, tgt_r, mel_mt, self.spec_scale_c, self.spec_off_c,
          noise, dstep, self.w_in, self.b_in_c, self.w_comb, self.b_comb,
          self.wo, self.bo_c, self.w_skip_scaled, self.b_skip_c, self.w_out,
          self.b_out_c)
        return jnp.sum(loss_parts) / np.float32(
            dec_t.shape[0] * self.mel_bins * T_valid)

    # -------------------- forward --------------------
    def forward(self, txt_tokens, mel2ph=None, spk_id=None, ref_mels=None,
                infer=False, rng=None):
        if infer:
            # TODO(synk): inference branch (iterative p_sample loop over K_step)
            # is not implemented.
            raise NotImplementedError("infer=True sampling loop not implemented")
        if self.loss_type != 'l1':
            # TODO(synk): only the 'l1' diffusion loss is fused into the kernel.
            raise NotImplementedError("only diff_loss_type='l1' is implemented")

        B, T_mel, M = ref_mels.shape
        H = self.hidden
        T_pad = ((T_mel + LANE - 1) // LANE) * LANE

        k1, k2 = jax.random.split(rng)
        t = jax.random.randint(k1, (B,), 0, self.K_step, dtype=jnp.int32)
        noise = jax.random.normal(k2, (B, M, T_pad), dtype=jnp.float32)

        # fs2 stand-in encoder + length regulation (plain-JAX gathers); the
        # expanded encoder output is produced directly in channel-major layout
        # so no big [B,T,H] transpose pass is needed.
        mel2ph_p = jnp.pad(mel2ph, ((0, 0), (0, T_pad - T_mel)))
        enc = self.token_emb[txt_tokens] \
            * (txt_tokens > 0).astype(jnp.float32)[..., None]            # [B,Ttxt,H]
        enc_pad_t = jnp.transpose(jnp.pad(enc, ((0, 0), (1, 0), (0, 0))),
                                  (0, 2, 1))                             # [B,H,Ttxt+1]
        idx = jnp.broadcast_to(mel2ph_p[:, None, :], (B, H, T_pad))
        dec_t = jnp.take_along_axis(enc_pad_t, idx, axis=2)              # [B,H,Tpad]
        sty_c = self.spk_emb[spk_id][:, :, None]                         # [B,H,1]
        tgt_r = (mel2ph_p > 0).astype(jnp.float32)[:, None, :]           # [B,1,Tpad]

        mel_mt = jnp.transpose(
            jnp.pad(ref_mels, ((0, 0), (0, T_pad - T_mel), (0, 0))),
            (0, 2, 1))                                                   # [B,M,Tpad]
        coef = jnp.stack([self.sqrt_alphas_cumprod[t],
                          self.sqrt_one_minus_alphas_cumprod[t]], axis=1)  # [B,2]
        dstep = self._step_projections(t)                                # [B,L,C,1]

        loss = self._fused_diff_loss(coef, dec_t, sty_c, tgt_r, mel_mt, noise,
                                     dstep, T_mel)
        return {'diff_loss': loss, 'mel_out': None, 't': t, 'noise': noise}


# ----------------------------------------------------------------------------
# pure-JAX reference of the same forward pass (unpadded layouts)
# ----------------------------------------------------------------------------
def _reference_diff_loss(model, txt_tokens, mel2ph, spk_id, ref_mels, t, noise_full):
    B, T, M = ref_mels.shape
    C = model.res_channels
    L = model.num_layers
    noise = noise_full[..., :T]

    enc = model.token_emb[txt_tokens] \
        * (txt_tokens > 0).astype(jnp.float32)[..., None]
    style = model.spk_emb[spk_id][:, None, :]
    enc_pad = jnp.pad(enc, ((0, 0), (1, 0), (0, 0)))
    idx = jnp.broadcast_to(mel2ph[..., None], (*mel2ph.shape, enc.shape[-1]))
    dec = jnp.take_along_axis(enc_pad, idx, axis=1)
    tgt = (mel2ph > 0).astype(jnp.float32)[:, :, None]
    cond = jnp.transpose((dec + style) * tgt, (0, 2, 1))                  # [B,H,T]

    x = (ref_mels - model.spec_min) / (model.spec_max - model.spec_min) * 2.0 - 1.0
    x = jnp.transpose(x, (0, 2, 1))                                       # [B,M,T]
    a = model.sqrt_alphas_cumprod[t][:, None, None]
    bb = model.sqrt_one_minus_alphas_cumprod[t][:, None, None]
    x_noisy = a * x + bb * noise

    h = jax.nn.relu(jnp.einsum('cm,bmt->bct', model.w_in, x_noisy)
                    + model.b_in[None, :, None])
    dstep = model._step_projections(t)[..., 0]                            # [B,L,C]
    skips = jnp.zeros_like(h)
    for l in range(L):
        d = model.dilations[l]
        y = h + dstep[:, l, :, None]
        yp = jnp.pad(y, ((0, 0), (0, 0), (d, d)))
        y_l = yp[:, :, :T]
        y_r = yp[:, :, 2 * d:2 * d + T]
        z = (jnp.einsum('kc,bct->bkt', model.wd[l, 0], y_l)
             + jnp.einsum('kc,bct->bkt', model.wd[l, 1], y)
             + jnp.einsum('kc,bct->bkt', model.wd[l, 2], y_r)
             + jnp.einsum('kh,bht->bkt', model.wc[l], cond)
             + (model.bd[l] + model.bc[l])[None, :, None])
        g = jax.nn.sigmoid(z[:, :C]) * jnp.tanh(z[:, C:])
        out = jnp.einsum('kc,bct->bkt', model.wo[l], g) + model.bo[l][None, :, None]
        h = (h + out[:, :C]) / math.sqrt(2.0)
        skips = skips + out[:, C:]
    skips = skips / math.sqrt(L)
    hs = jax.nn.relu(jnp.einsum('dc,bct->bdt', model.w_skip, skips)
                     + model.b_skip[None, :, None])
    x_recon = jnp.einsum('mc,bct->bmt', model.w_out, hs) + model.b_out[None, :, None]
    return jnp.mean(jnp.abs(noise - x_recon))


# ----------------------------------------------------------------------------
if __name__ == "__main__":
    B, T_txt, T_mel, M, H = 2, 8, 16, 16, 32
    dict_size = 50
    hparams = dict(
        audio_num_mel_bins=M, keep_bins=M, hidden_size=H,
        residual_channels=32, residual_layers=4, dilation_cycle_length=2,
        timesteps=100, K_step=71, diff_loss_type='l1',
        schedule_type='cosine', max_beta=0.06,
        spec_min=list(np.linspace(-6.0, -4.0, M)),
        spec_max=list(np.linspace(0.5, 1.5, M)),
        num_spk=4,
    )

    model = GaussianDiffusionPallas(dict_size, hparams,
                                    param_key=jax.random.PRNGKey(42))

    key = jax.random.PRNGKey(0)
    k_tok, k_m2p, k_mel, k_fwd = jax.random.split(key, 4)
    txt_tokens = jax.random.randint(k_tok, (B, T_txt), 1, dict_size, dtype=jnp.int32)
    txt_tokens = txt_tokens.at[:, -2:].set(0)                          # padding tail
    mel2ph = jax.random.randint(k_m2p, (B, T_mel), 1, T_txt - 1, dtype=jnp.int32)
    mel2ph = mel2ph.at[:, -3:].set(0)                                  # padded frames
    spk_id = jnp.array([0, 1], dtype=jnp.int32)
    ref_mels = jax.random.normal(k_mel, (B, T_mel, M), dtype=jnp.float32) * 2.0 - 4.0

    ret = model.forward(txt_tokens, mel2ph=mel2ph, spk_id=spk_id,
                        ref_mels=ref_mels, infer=False, rng=k_fwd)
    loss = jax.block_until_ready(ret['diff_loss'])
    assert bool(jnp.isfinite(loss)), "diffusion loss is not finite"

    # cross-check the fused kernel against a pure-JAX reference
    ref_loss = jax.block_until_ready(
        _reference_diff_loss(model, txt_tokens, mel2ph, spk_id, ref_mels,
                             ret['t'], ret['noise']))
    assert bool(jnp.allclose(loss, ref_loss, rtol=2e-2, atol=2e-3)), \
        (float(loss), float(ref_loss))
    print("KERNEL_OK")
</pallas_src>

<mosaic_0001>
module attributes {stable_mosaic.version = 11 : i64} {
  func.func @_fused_diff_loss_kernel(%arg0: i32, %arg1: i32, %arg2: memref<2x2xf32, #tpu.memory_space<smem>>, %arg3: memref<1x32x128xf32, #tpu.memory_space<vmem>>, %arg4: memref<1x32x1xf32, #tpu.memory_space<vmem>>, %arg5: memref<1x1x128xf32, #tpu.memory_space<vmem>>, %arg6: memref<1x16x128xf32, #tpu.memory_space<vmem>>, %arg7: memref<16x1xf32, #tpu.memory_space<vmem>>, %arg8: memref<16x1xf32, #tpu.memory_space<vmem>>, %arg9: memref<1x16x128xf32, #tpu.memory_space<vmem>>, %arg10: memref<1x1x32x1xf32, #tpu.memory_space<vmem>>, %arg11: memref<32x16xf32, #tpu.memory_space<vmem>>, %arg12: memref<32x1xf32, #tpu.memory_space<vmem>>, %arg13: memref<1x64x128xf32, #tpu.memory_space<vmem>>, %arg14: memref<1x64x1xf32, #tpu.memory_space<vmem>>, %arg15: memref<1x64x32xf32, #tpu.memory_space<vmem>>, %arg16: memref<1x64x1xf32, #tpu.memory_space<vmem>>, %arg17: memref<32x32xf32, #tpu.memory_space<vmem>>, %arg18: memref<32x1xf32, #tpu.memory_space<vmem>>, %arg19: memref<16x32xf32, #tpu.memory_space<vmem>>, %arg20: memref<16x1xf32, #tpu.memory_space<vmem>>, %arg21: memref<1x1x128xf32, #tpu.memory_space<vmem>>, %arg22: memref<128x128xf32, #tpu.memory_space<vmem>>, %arg23: memref<32x128xf32, #tpu.memory_space<vmem>>, %arg24: memref<32x128xf32, #tpu.memory_space<vmem>>) attributes {dimension_semantics = [#tpu.dimension_semantics<parallel>, #tpu.dimension_semantics<arbitrary>], iteration_bounds = array<i64: 2, 4>, scalar_prefetch = 0 : i64, scratch_operands = 3 : i64, tpu.core_type = #tpu.core_type<tc>, window_params = [{transform_indices = @transform_0, window_bounds = array<i64: 2, 2>}, {transform_indices = @transform_1, window_bounds = array<i64: 1, 32, 128>}, {transform_indices = @transform_2, window_bounds = array<i64: 1, 32, 1>}, {transform_indices = @transform_3, window_bounds = array<i64: 1, 1, 128>}, {transform_indices = @transform_4, window_bounds = array<i64: 1, 16, 128>}, {pipeline_mode = #tpu.pipeline_mode<synchronous>, transform_indices = @transform_5, window_bounds = array<i64: 16, 1>}, {pipeline_mode = #tpu.pipeline_mode<synchronous>, transform_indices = @transform_6, window_bounds = array<i64: 16, 1>}, {transform_indices = @transform_7, window_bounds = array<i64: 1, 16, 128>}, {transform_indices = @transform_8, window_bounds = array<i64: 1, 1, 32, 1>}, {pipeline_mode = #tpu.pipeline_mode<synchronous>, transform_indices = @transform_9, window_bounds = array<i64: 32, 16>}, {pipeline_mode = #tpu.pipeline_mode<synchronous>, transform_indices = @transform_10, window_bounds = array<i64: 32, 1>}, {transform_indices = @transform_11, window_bounds = array<i64: 1, 64, 128>}, {transform_indices = @transform_12, window_bounds = array<i64: 1, 64, 1>}, {transform_indices = @transform_13, window_bounds = array<i64: 1, 64, 32>}, {transform_indices = @transform_14, window_bounds = array<i64: 1, 64, 1>}, {pipeline_mode = #tpu.pipeline_mode<synchronous>, transform_indices = @transform_15, window_bounds = array<i64: 32, 32>}, {pipeline_mode = #tpu.pipeline_mode<synchronous>, transform_indices = @transform_16, window_bounds = array<i64: 32, 1>}, {pipeline_mode = #tpu.pipeline_mode<synchronous>, transform_indices = @transform_17, window_bounds = array<i64: 16, 32>}, {pipeline_mode = #tpu.pipeline_mode<synchronous>, transform_indices = @transform_18, window_bounds = array<i64: 16, 1>}, {transform_indices = @transform_19, window_bounds = array<i64: 1, 1, 128>}]} {
    %c0_i32 = arith.constant 0 : i32
    %0 = arith.cmpi eq, %arg1, %c0_i32 : i32
    %1 = arith.extui %0 : i1 to i32
    %c0_i32_0 = arith.constant 0 : i32
    %2 = arith.cmpi ne, %1, %c0_i32_0 : i32
    scf.if %2 {
      %c0_40 = arith.constant 0 : index
      %c0_41 = arith.constant 0 : index
      %c0_42 = arith.constant 0 : index
      %66 = vector.load %arg3[%c0_40, %c0_41, %c0_42] : memref<1x32x128xf32, #tpu.memory_space<vmem>>, vector<1x32x128xf32>
      %67 = vector.shape_cast %66 : vector<1x32x128xf32> to vector<32x128xf32>
      %c0_43 = arith.constant 0 : index
      %c0_44 = arith.constant 0 : index
      %c0_45 = arith.constant 0 : index
      %68 = vector.load %arg4[%c0_43, %c0_44, %c0_45] : memref<1x32x1xf32, #tpu.memory_space<vmem>>, vector<1x32x1xf32>
      %69 = vector.shape_cast %68 : vector<1x32x1xf32> to vector<32x1xf32>
      %70 = vector.broadcast %69 : vector<32x1xf32> to vector<32x128xf32>
      %71 = arith.addf %67, %70 : vector<32x128xf32>
      %c0_46 = arith.constant 0 : index
      %c0_47 = arith.constant 0 : index
      %c0_48 = arith.constant 0 : index
      %72 = vector.load %arg5[%c0_46, %c0_47, %c0_48] : memref<1x1x128xf32, #tpu.memory_space<vmem>>, vector<1x1x128xf32>
      %73 = vector.shape_cast %72 : vector<1x1x128xf32> to vector<1x128xf32>
      %74 = vector.broadcast %73 : vector<1x128xf32> to vector<32x128xf32>
      %75 = arith.mulf %71, %74 : vector<32x128xf32>
      %c96 = arith.constant 96 : index
      %c0_49 = arith.constant 0 : index
      %76 = vector.load %arg22[%c96, %c0_49] : memref<128x128xf32, #tpu.memory_space<vmem>>, vector<32x128xf32>
      tpu.vector_store %arg22[%c96, %c0_49], %75 {strides = array<i32>} : memref<128x128xf32, #tpu.memory_space<vmem>>, vector<32x128xf32>,
      %c0_50 = arith.constant 0 : index
      %c0_51 = arith.constant 0 : index
      %c0_52 = arith.constant 0 : index
      %77 = vector.load %arg6[%c0_50, %c0_51, %c0_52] : memref<1x16x128xf32, #tpu.memory_space<vmem>>, vector<1x16x128xf32>
      %78 = vector.shape_cast %77 : vector<1x16x128xf32> to vector<16x128xf32>
      %c0_53 = arith.constant 0 : index
      %c0_54 = arith.constant 0 : index
      %79 = vector.load %arg7[%c0_53, %c0_54] : memref<16x1xf32, #tpu.memory_space<vmem>>, vector<16x1xf32>
      %80 = vector.broadcast %79 : vector<16x1xf32> to vector<16x128xf32>
      %81 = arith.mulf %78, %80 : vector<16x128xf32>
      %c0_55 = arith.constant 0 : index
      %c0_56 = arith.constant 0 : index
      %82 = vector.load %arg8[%c0_55, %c0_56] : memref<16x1xf32, #tpu.memory_space<vmem>>, vector<16x1xf32>
      %83 = vector.broadcast %82 : vector<16x1xf32> to vector<16x128xf32>
      %84 = arith.addf %81, %83 : vector<16x128xf32>
      %85 = arith.index_cast %arg0 : i32 to index
      %c0_57 = arith.constant 0 : index
      %86 = memref.load %arg2[%85, %c0_57] : memref<2x2xf32, #tpu.memory_space<smem>>
      %87 = vector.broadcast %86 : f32 to vector<16x128xf32>
      %88 = arith.mulf %87, %84 : vector<16x128xf32>
      %89 = arith.index_cast %arg0 : i32 to index
      %c1 = arith.constant 1 : index
      %90 = memref.load %arg2[%89, %c1] : memref<2x2xf32, #tpu.memory_space<smem>>
      %c0_58 = arith.constant 0 : index
      %c0_59 = arith.constant 0 : index
      %c0_60 = arith.constant 0 : index
      %91 = vector.load %arg9[%c0_58, %c0_59, %c0_60] : memref<1x16x128xf32, #tpu.memory_space<vmem>>, vector<1x16x128xf32>
      %92 = vector.shape_cast %91 : vector<1x16x128xf32> to vector<16x128xf32>
      %93 = vector.broadcast %90 : f32 to vector<16x128xf32>
      %94 = arith.mulf %93, %92 : vector<16x128xf32>
      %95 = arith.addf %88, %94 : vector<16x128xf32>
      %c0_61 = arith.constant 0 : index
      %c0_62 = arith.constant 0 : index
      %96 = vector.load %arg11[%c0_61, %c0_62] : memref<32x16xf32, #tpu.memory_space<vmem>>, vector<32x16xf32>
      %cst_63 = arith.constant dense<0.000000e+00> : vector<32x128xf32>
      %97 = tpu.matmul %96, %95, %cst_63 {dimension_numbers = #tpu.dot_dimension_numbers<[1], [0], [0], [1], [0, 0, 1, 1], [], []>} : vector<32x16xf32>, vector<16x128xf32>, vector<32x128xf32> -> vector<32x128xf32>
      %c0_64 = arith.constant 0 : index
      %c0_65 = arith.constant 0 : index
      %98 = vector.load %arg12[%c0_64, %c0_65] : memref<32x1xf32, #tpu.memory_space<vmem>>, vector<32x1xf32>
      %99 = vector.broadcast %98 : vector<32x1xf32> to vector<32x128xf32>
      %100 = arith.addf %97, %99 : vector<32x128xf32>
      %cst_66 = arith.constant 0.000000e+00 : f32
      %101 = vector.broadcast %cst_66 : f32 to vector<32x128xf32>
      %102 = arith.maximumf %100, %101 : vector<32x128xf32>
      %c0_67 = arith.constant 0 : index
      %c0_68 = arith.constant 0 : index
      %103 = vector.load %arg23[%c0_67, %c0_68] : memref<32x128xf32, #tpu.memory_space<vmem>>, vector<32x128xf32>
      tpu.vector_store %arg23[%c0_67, %c0_68], %102 {strides = array<i32>} : memref<32x128xf32, #tpu.memory_space<vmem>>, vector<32x128xf32>,
      %cst_69 = arith.constant 0.000000e+00 : f32
      %104 = vector.broadcast %cst_69 : f32 to vector<32x128xf32>
      %c0_70 = arith.constant 0 : index
      %c0_71 = arith.constant 0 : index
      %105 = vector.load %arg24[%c0_70, %c0_71] : memref<32x128xf32, #tpu.memory_space<vmem>>, vector<32x128xf32>
      tpu.vector_store %arg24[%c0_70, %c0_71], %104 {strides = array<i32>} : memref<32x128xf32, #tpu.memory_space<vmem>>, vector<32x128xf32>,
    } else {
    }
    %c0 = arith.constant 0 : index
    %c0_1 = arith.constant 0 : index
    %3 = vector.load %arg23[%c0, %c0_1] : memref<32x128xf32, #tpu.memory_space<vmem>>, vector<32x128xf32>
    %c0_2 = arith.constant 0 : index
    %c0_3 = arith.constant 0 : index
    %c0_4 = arith.constant 0 : index
    %c0_5 = arith.constant 0 : index
    %4 = vector.load %arg10[%c0_2, %c0_3, %c0_4, %c0_5] : memref<1x1x32x1xf32, #tpu.memory_space<vmem>>, vector<1x1x32x1xf32>
    %5 = vector.shape_cast %4 : vector<1x1x32x1xf32> to vector<32x1xf32>
    %6 = vector.broadcast %5 : vector<32x1xf32> to vector<32x128xf32>
    %7 = arith.addf %3, %6 : vector<32x128xf32>
    %8 = tpu.iota {dimensions = array<i32: 1>} : vector<32x128xi32>
    %c16_i32 = arith.constant 16 : i32
    %9 = vector.broadcast %c16_i32 : i32 to vector<32x128xi32>
    %10 = arith.cmpi slt, %8, %9 : vector<32x128xi32>
    %cst = arith.constant 0.000000e+00 : f32
    %11 = vector.broadcast %cst : f32 to vector<32x128xf32>
    %12 = arith.select %10, %7, %11 : vector<32x128xi1>, vector<32x128xf32>
    %c32 = arith.constant 32 : index
    %c0_6 = arith.constant 0 : index
    %13 = vector.load %arg22[%c32, %c0_6] : memref<128x128xf32, #tpu.memory_space<vmem>>, vector<32x128xf32>
    tpu.vector_store %arg22[%c32, %c0_6], %12 {strides = array<i32>} : memref<128x128xf32, #tpu.memory_space<vmem>>, vector<32x128xf32>,
    %c2_i32 = arith.constant 2 : i32
    %c0_i32_7 = arith.constant 0 : i32
    %14 = arith.cmpi eq, %c2_i32, %c0_i32_7 : i32
    %c1_i32 = arith.constant 1 : i32
    %15 = arith.select %14, %c1_i32, %c2_i32 : i32
    %16 = arith.remsi %arg1, %15 : i32
    %c0_i32_8 = arith.constant 0 : i32
    %17 = arith.cmpi ne, %16, %c0_i32_8 : i32
    %c0_i32_9 = arith.constant 0 : i32
    %18 = arith.cmpi slt, %16, %c0_i32_9 : i32
    %c0_i32_10 = arith.constant 0 : i32
    %19 = arith.cmpi slt, %15, %c0_i32_10 : i32
    %20 = arith.xori %18, %19 : i1
    %21 = arith.andi %20, %17 : i1
    %22 = arith.addi %16, %15 : i32
    %23 = arith.select %21, %22, %16 : i32
    %c0_i32_11 = arith.constant 0 : i32
    %24 = arith.cmpi eq, %23, %c0_i32_11 : i32
    %25 = arith.extui %24 : i1 to i32
    %c0_i32_12 = arith.constant 0 : i32
    %26 = arith.cmpi ne, %25, %c0_i32_12 : i32
    scf.if %26 {
      %c1_i32_40 = arith.constant 1 : i32
      %66 = vector.broadcast %c1_i32_40 : i32 to vector<32x128xi32>
      %67 = arith.cmpi sge, %8, %66 : vector<32x128xi32>
      %c1_i32_41 = arith.constant 1 : i32
      %68 = tpu.dynamic_rotate %12 by %c1_i32_41 dim 1 : vector<32x128xf32>, i32 -> vector<32x128xf32>
      %cst_42 = arith.constant 0.000000e+00 : f32
      %69 = vector.broadcast %cst_42 : f32 to vector<32x128xf32>
      %70 = arith.select %67, %68, %69 : vector<32x128xi1>, vector<32x128xf32>
      %c0_43 = arith.constant 0 : index
      %c0_44 = arith.constant 0 : index
      %71 = vector.load %arg22[%c0_43, %c0_44] : memref<128x128xf32, #tpu.memory_space<vmem>>, vector<32x128xf32>
      tpu.vector_store %arg22[%c0_43, %c0_44], %70 {strides = array<i32>} : memref<128x128xf32, #tpu.memory_space<vmem>>, vector<32x128xf32>,
      %c127_i32 = arith.constant 127 : i32
      %72 = vector.broadcast %c127_i32 : i32 to vector<32x128xi32>
      %73 = arith.cmpi slt, %8, %72 : vector<32x128xi32>
      %c127_i32_45 = arith.constant 127 : i32
      %74 = tpu.dynamic_rotate %12 by %c127_i32_45 dim 1 : vector<32x128xf32>, i32 -> vector<32x128xf32>
      %cst_46 = arith.constant 0.000000e+00 : f32
      %75 = vector.broadcast %cst_46 : f32 to vector<32x128xf32>
      %76 = arith.select %73, %74, %75 : vector<32x128xi1>, vector<32x128xf32>
      %c64 = arith.constant 64 : index
      %c0_47 = arith.constant 0 : index
      %77 = vector.load %arg22[%c64, %c0_47] : memref<128x128xf32, #tpu.memory_space<vmem>>, vector<32x128xf32>
      tpu.vector_store %arg22[%c64, %c0_47], %76 {strides = array<i32>} : memref<128x128xf32, #tpu.memory_space<vmem>>, vector<32x128xf32>,
    } else {
    }
    %c1_i32_13 = arith.constant 1 : i32
    %27 = arith.cmpi eq, %23, %c1_i32_13 : i32
    %28 = arith.extui %27 : i1 to i32
    %c0_i32_14 = arith.constant 0 : i32
    %29 = arith.cmpi ne, %28, %c0_i32_14 : i32
    scf.if %29 {
      %c2_i32_40 = arith.constant 2 : i32
      %66 = vector.broadcast %c2_i32_40 : i32 to vector<32x128xi32>
      %67 = arith.cmpi sge, %8, %66 : vector<32x128xi32>
      %c2_i32_41 = arith.constant 2 : i32
      %68 = tpu.dynamic_rotate %12 by %c2_i32_41 dim 1 : vector<32x128xf32>, i32 -> vector<32x128xf32>
      %cst_42 = arith.constant 0.000000e+00 : f32
      %69 = vector.broadcast %cst_42 : f32 to vector<32x128xf32>
      %70 = arith.select %67, %68, %69 : vector<32x128xi1>, vector<32x128xf32>
      %c0_43 = arith.constant 0 : index
      %c0_44 = arith.constant 0 : index
      %71 = vector.load %arg22[%c0_43, %c0_44] : memref<128x128xf32, #tpu.memory_space<vmem>>, vector<32x128xf32>
      tpu.vector_store %arg22[%c0_43, %c0_44], %70 {strides = array<i32>} : memref<128x128xf32, #tpu.memory_space<vmem>>, vector<32x128xf32>,
      %c126_i32 = arith.constant 126 : i32
      %72 = vector.broadcast %c126_i32 : i32 to vector<32x128xi32>
      %73 = arith.cmpi slt, %8, %72 : vector<32x128xi32>
      %c126_i32_45 = arith.constant 126 : i32
      %74 = tpu.dynamic_rotate %12 by %c126_i32_45 dim 1 : vector<32x128xf32>, i32 -> vector<32x128xf32>
      %cst_46 = arith.constant 0.000000e+00 : f32
      %75 = vector.broadcast %cst_46 : f32 to vector<32x128xf32>
      %76 = arith.select %73, %74, %75 : vector<32x128xi1>, vector<32x128xf32>
      %c64 = arith.constant 64 : index
      %c0_47 = arith.constant 0 : index
      %77 = vector.load %arg22[%c64, %c0_47] : memref<128x128xf32, #tpu.memory_space<vmem>>, vector<32x128xf32>
      tpu.vector_store %arg22[%c64, %c0_47], %76 {strides = array<i32>} : memref<128x128xf32, #tpu.memory_space<vmem>>, vector<32x128xf32>,
    } else {
    }
    %c0_15 = arith.constant 0 : index
    %c0_16 = arith.constant 0 : index
    %c0_17 = arith.constant 0 : index
    %30 = vector.load %arg13[%c0_15, %c0_16, %c0_17] : memref<1x64x128xf32, #tpu.memory_space<vmem>>, vector<1x64x128xf32>
    %31 = vector.shape_cast %30 : vector<1x64x128xf32> to vector<64x128xf32>
    %c0_18 = arith.constant 0 : index
    %c0_19 = arith.constant 0 : index
    %32 = vector.load %arg22[%c0_18, %c0_19] : memref<128x128xf32, #tpu.memory_space<vmem>>, vector<128x128xf32>
    %cst_20 = arith.constant dense<0.000000e+00> : vector<64x128xf32>
    %33 = tpu.matmul %31, %32, %cst_20 {dimension_numbers = #tpu.dot_dimension_numbers<[1], [0], [0], [1], [0, 0, 1, 1], [], []>} : vector<64x128xf32>, vector<128x128xf32>, vector<64x128xf32> -> vector<64x128xf32>
    %c0_21 = arith.constant 0 : index
    %c0_22 = arith.constant 0 : index
    %c0_23 = arith.constant 0 : index
    %34 = vector.load %arg14[%c0_21, %c0_22, %c0_23] : memref<1x64x1xf32, #tpu.memory_space<vmem>>, vector<1x64x1xf32>
    %35 = vector.shape_cast %34 : vector<1x64x1xf32> to vector<64x1xf32>
    %36 = vector.broadcast %35 : vector<64x1xf32> to vector<64x128xf32>
    %37 = arith.addf %33, %36 : vector<64x128xf32>
    %38 = vector.extract_strided_slice %37 {offsets = [0, 0], sizes = [32, 128], strides = [1, 1]} : vector<64x128xf32> to vector<32x128xf32>
    %39 = arith.negf %38 : vector<32x128xf32>
    %40 = math.exp %39 : vector<32x128xf32>
    %cst_24 = arith.constant 1.000000e+00 : f32
    %41 = vector.broadcast %cst_24 : f32 to vector<32x128xf32>
    %42 = arith.addf %41, %40 : vector<32x128xf32>
    %43 = arith.divf %41, %42 : vector<32x128xf32>
    %44 = vector.extract_strided_slice %37 {offsets = [32, 0], sizes = [32, 128], strides = [1, 1]} : vector<64x128xf32> to vector<32x128xf32>
    %45 = math.tanh %44 : vector<32x128xf32>
    %46 = arith.mulf %43, %45 : vector<32x128xf32>
    %c0_25 = arith.constant 0 : index
    %c0_26 = arith.constant 0 : index
    %c0_27 = arith.constant 0 : index
    %47 = vector.load %arg15[%c0_25, %c0_26, %c0_27] : memref<1x64x32xf32, #tpu.memory_space<vmem>>, vector<1x64x32xf32>
    %48 = vector.shape_cast %47 : vector<1x64x32xf32> to vector<64x32xf32>
    %cst_28 = arith.constant dense<0.000000e+00> : vector<64x128xf32>
    %49 = tpu.matmul %48, %46, %cst_28 {dimension_numbers = #tpu.dot_dimension_numbers<[1], [0], [0], [1], [0, 0, 1, 1], [], []>} : vector<64x32xf32>, vector<32x128xf32>, vector<64x128xf32> -> vector<64x128xf32>
    %c0_29 = arith.constant 0 : index
    %c0_30 = arith.constant 0 : index
    %c0_31 = arith.constant 0 : index
    %50 = vector.load %arg16[%c0_29, %c0_30, %c0_31] : memref<1x64x1xf32, #tpu.memory_space<vmem>>, vector<1x64x1xf32>
    %51 = vector.shape_cast %50 : vector<1x64x1xf32> to vector<64x1xf32>
    %52 = vector.broadcast %51 : vector<64x1xf32> to vector<64x128xf32>
    %53 = arith.addf %49, %52 : vector<64x128xf32>
    %54 = vector.extract_strided_slice %53 {offsets = [0, 0], sizes = [32, 128], strides = [1, 1]} : vector<64x128xf32> to vector<32x128xf32>
    %55 = arith.addf %3, %54 : vector<32x128xf32>
    %cst_32 = arith.constant 0.707106769 : f32
    %56 = vector.broadcast %cst_32 : f32 to vector<32x128xf32>
    %57 = arith.mulf %55, %56 : vector<32x128xf32>
    %c0_33 = arith.constant 0 : index
    %c0_34 = arith.constant 0 : index
    %58 = vector.load %arg23[%c0_33, %c0_34] : memref<32x128xf32, #tpu.memory_space<vmem>>, vector<32x128xf32>
    tpu.vector_store %arg23[%c0_33, %c0_34], %57 {strides = array<i32>} : memref<32x128xf32, #tpu.memory_space<vmem>>, vector<32x128xf32>,
    %c0_35 = arith.constant 0 : index
    %c0_36 = arith.constant 0 : index
    %59 = vector.load %arg24[%c0_35, %c0_36] : memref<32x128xf32, #tpu.memory_space<vmem>>, vector<32x128xf32>
    %60 = vector.extract_strided_slice %53 {offsets = [32, 0], sizes = [32, 128], strides = [1, 1]} : vector<64x128xf32> to vector<32x128xf32>
    %61 = arith.addf %59, %60 : vector<32x128xf32>
    %c0_37 = arith.constant 0 : index
    %c0_38 = arith.constant 0 : index
    %62 = vector.load %arg24[%c0_37, %c0_38] : memref<32x128xf32, #tpu.memory_space<vmem>>, vector<32x128xf32>
    tpu.vector_store %arg24[%c0_37, %c0_38], %61 {strides = array<i32>} : memref<32x128xf32, #tpu.memory_space<vmem>>, vector<32x128xf32>,
    %c3_i32 = arith.constant 3 : i32
    %63 = arith.cmpi eq, %arg1, %c3_i32 : i32
    %64 = arith.extui %63 : i1 to i32
    %c0_i32_39 = arith.constant 0 : i32
    %65 = arith.cmpi ne, %64, %c0_i32_39 : i32
    scf.if %65 {
      %c0_40 = arith.constant 0 : index
      %c0_41 = arith.constant 0 : index
      %66 = vector.load %arg17[%c0_40, %c0_41] : memref<32x32xf32, #tpu.memory_space<vmem>>, vector<32x32xf32>
      %c0_42 = arith.constant 0 : index
      %c0_43 = arith.constant 0 : index
      %67 = vector.load %arg24[%c0_42, %c0_43] : memref<32x128xf32, #tpu.memory_space<vmem>>, vector<32x128xf32>
      %cst_44 = arith.constant dense<0.000000e+00> : vector<32x128xf32>
      %68 = tpu.matmul %66, %67, %cst_44 {dimension_numbers = #tpu.dot_dimension_numbers<[1], [0], [0], [1], [0, 0, 1, 1], [], []>} : vector<32x32xf32>, vector<32x128xf32>, vector<32x128xf32> -> vector<32x128xf32>
      %c0_45 = arith.constant 0 : index
      %c0_46 = arith.constant 0 : index
      %69 = vector.load %arg18[%c0_45, %c0_46] : memref<32x1xf32, #tpu.memory_space<vmem>>, vector<32x1xf32>
      %70 = vector.broadcast %69 : vector<32x1xf32> to vector<32x128xf32>
      %71 = arith.addf %68, %70 : vector<32x128xf32>
      %cst_47 = arith.constant 0.000000e+00 : f32
      %72 = vector.broadcast %cst_47 : f32 to vector<32x128xf32>
      %73 = arith.maximumf %71, %72 : vector<32x128xf32>
      %c0_48 = arith.constant 0 : index
      %c0_49 = arith.constant 0 : index
      %74 = vector.load %arg19[%c0_48, %c0_49] : memref<16x32xf32, #tpu.memory_space<vmem>>, vector<16x32xf32>
      %cst_50 = arith.constant dense<0.000000e+00> : vector<16x128xf32>
      %75 = tpu.matmul %74, %73, %cst_50 {dimension_numbers = #tpu.dot_dimension_numbers<[1], [0], [0], [1], [0, 0, 1, 1], [], []>} : vector<16x32xf32>, vector<32x128xf32>, vector<16x128xf32> -> vector<16x128xf32>
      %c0_51 = arith.constant 0 : index
      %c0_52 = arith.constant 0 : index
      %76 = vector.load %arg20[%c0_51, %c0_52] : memref<16x1xf32, #tpu.memory_space<vmem>>, vector<16x1xf32>
      %77 = vector.broadcast %76 : vector<16x1xf32> to vector<16x128xf32>
      %78 = arith.addf %75, %77 : vector<16x128xf32>
      %c0_53 = arith.constant 0 : index
      %c0_54 = arith.constant 0 : index
      %c0_55 = arith.constant 0 : index
      %79 = vector.load %arg9[%c0_53, %c0_54, %c0_55] : memref<1x16x128xf32, #tpu.memory_space<vmem>>, vector<1x16x128xf32>
      %80 = vector.shape_cast %79 : vector<1x16x128xf32> to vector<16x128xf32>
      %81 = arith.subf %80, %78 : vector<16x128xf32>
      %82 = math.absf %81 : vector<16x128xf32>
      %83 = tpu.iota {dimensions = array<i32: 1>} : vector<16x128xi32>
      %c16_i32_56 = arith.constant 16 : i32
      %84 = vector.broadcast %c16_i32_56 : i32 to vector<16x128xi32>
      %85 = arith.cmpi slt, %83, %84 : vector<16x128xi32>
      %cst_57 = arith.constant 0.000000e+00 : f32
      %86 = vector.broadcast %cst_57 : f32 to vector<16x128xf32>
      %87 = arith.select %85, %82, %86 : vector<16x128xi1>, vector<16x128xf32>
      %cst_58 = arith.constant dense<0.000000e+00> : vector<128xf32>
      %88 = vector.multi_reduction <add>, %87, %cst_58 [0] : vector<16x128xf32> to vector<128xf32>
      %89 = vector.shape_cast %88 : vector<128xf32> to vector<1x128xf32>
      %c0_59 = arith.constant 0 : index
      %c0_60 = arith.constant 0 : index
      %c0_61 = arith.constant 0 : index
      %90 = vector.load %arg21[%c0_59, %c0_60, %c0_61] : memref<1x1x128xf32, #tpu.memory_space<vmem>>, vector<1x1x128xf32>
      %91 = vector.shape_cast %90 : vector<1x1x128xf32> to vector<1x128xf32>
      %92 = vector.shape_cast %89 : vector<1x128xf32> to vector<1x1x128xf32>
      tpu.vector_store %arg21[%c0_59, %c0_60, %c0_61], %92 {strides = array<i32>} : memref<1x1x128xf32, #tpu.memory_space<vmem>>, vector<1x1x128xf32>,
    } else {
    }
    return
  }
  func.func @transform_0(%arg0: i32, %arg1: i32) -> (i32, i32) {
    %c0_i32 = arith.constant 0 : i32
    %c0_i32_0 = arith.constant 0 : i32
    %c0_i32_1 = arith.constant 0 : i32
    return %c0_i32, %c0_i32_0 : i32, i32
  }
  func.func @transform_1(%arg0: i32, %arg1: i32) -> (i32, i32, i32) {
    %c0_i32 = arith.constant 0 : i32
    %c0_i32_0 = arith.constant 0 : i32
    %c0_i32_1 = arith.constant 0 : i32
    return %arg0, %c0_i32, %c0_i32_0 : i32, i32, i32
  }
  func.func @transform_2(%arg0: i32, %arg1: i32) -> (i32, i32, i32) {
    %c0_i32 = arith.constant 0 : i32
    %c0_i32_0 = arith.constant 0 : i32
    %c0_i32_1 = arith.constant 0 : i32
    return %arg0, %c0_i32, %c0_i32_0 : i32, i32, i32
  }
  func.func @transform_3(%arg0: i32, %arg1: i32) -> (i32, i32, i32) {
    %c0_i32 = arith.constant 0 : i32
    %c0_i32_0 = arith.constant 0 : i32
    %c0_i32_1 = arith.constant 0 : i32
    return %arg0, %c0_i32, %c0_i32_0 : i32, i32, i32
  }
  func.func @transform_4(%arg0: i32, %arg1: i32) -> (i32, i32, i32) {
    %c0_i32 = arith.constant 0 : i32
    %c0_i32_0 = arith.constant 0 : i32
    %c0_i32_1 = arith.constant 0 : i32
    return %arg0, %c0_i32, %c0_i32_0 : i32, i32, i32
  }
  func.func @transform_5(%arg0: i32, %arg1: i32) -> (i32, i32) {
    %c0_i32 = arith.constant 0 : i32
    %c0_i32_0 = arith.constant 0 : i32
    %c0_i32_1 = arith.constant 0 : i32
    return %c0_i32, %c0_i32_0 : i32, i32
  }
  func.func @transform_6(%arg0: i32, %arg1: i32) -> (i32, i32) {
    %c0_i32 = arith.constant 0 : i32
    %c0_i32_0 = arith.constant 0 : i32
    %c0_i32_1 = arith.constant 0 : i32
    return %c0_i32, %c0_i32_0 : i32, i32
  }
  func.func @transform_7(%arg0: i32, %arg1: i32) -> (i32, i32, i32) {
    %c0_i32 = arith.constant 0 : i32
    %c0_i32_0 = arith.constant 0 : i32
    %c0_i32_1 = arith.constant 0 : i32
    return %arg0, %c0_i32, %c0_i32_0 : i32, i32, i32
  }
  func.func @transform_8(%arg0: i32, %arg1: i32) -> (i32, i32, i32, i32) {
    %c0_i32 = arith.constant 0 : i32
    %c0_i32_0 = arith.constant 0 : i32
    %c0_i32_1 = arith.constant 0 : i32
    return %arg0, %arg1, %c0_i32, %c0_i32_0 : i32, i32, i32, i32
  }
  func.func @transform_9(%arg0: i32, %arg1: i32) -> (i32, i32) {
    %c0_i32 = arith.constant 0 : i32
    %c0_i32_0 = arith.constant 0 : i32
    %c0_i32_1 = arith.constant 0 : i32
    return %c0_i32, %c0_i32_0 : i32, i32
  }
  func.func @transform_10(%arg0: i32, %arg1: i32) -> (i32, i32) {
    %c0_i32 = arith.constant 0 : i32
    %c0_i32_0 = arith.constant 0 : i32
    %c0_i32_1 = arith.constant 0 : i32
    return %c0_i32, %c0_i32_0 : i32, i32
  }
  func.func @transform_11(%arg0: i32, %arg1: i32) -> (i32, i32, i32) {
    %c0_i32 = arith.constant 0 : i32
    %c0_i32_0 = arith.constant 0 : i32
    %c0_i32_1 = arith.constant 0 : i32
    return %arg1, %c0_i32, %c0_i32_0 : i32, i32, i32
  }
  func.func @transform_12(%arg0: i32, %arg1: i32) -> (i32, i32, i32) {
    %c0_i32 = arith.constant 0 : i32
    %c0_i32_0 = arith.constant 0 : i32
    %c0_i32_1 = arith.constant 0 : i32
    return %arg1, %c0_i32, %c0_i32_0 : i32, i32, i32
  }
  func.func @transform_13(%arg0: i32, %arg1: i32) -> (i32, i32, i32) {
    %c0_i32 = arith.constant 0 : i32
    %c0_i32_0 = arith.constant 0 : i32
    %c0_i32_1 = arith.constant 0 : i32
    return %arg1, %c0_i32, %c0_i32_0 : i32, i32, i32
  }
  func.func @transform_14(%arg0: i32, %arg1: i32) -> (i32, i32, i32) {
    %c0_i32 = arith.constant 0 : i32
    %c0_i32_0 = arith.constant 0 : i32
    %c0_i32_1 = arith.constant 0 : i32
    return %arg1, %c0_i32, %c0_i32_0 : i32, i32, i32
  }
  func.func @transform_15(%arg0: i32, %arg1: i32) -> (i32, i32) {
    %c0_i32 = arith.constant 0 : i32
    %c0_i32_0 = arith.constant 0 : i32
    %c0_i32_1 = arith.constant 0 : i32
    return %c0_i32, %c0_i32_0 : i32, i32
  }
  func.func @transform_16(%arg0: i32, %arg1: i32) -> (i32, i32) {
    %c0_i32 = arith.constant 0 : i32
    %c0_i32_0 = arith.constant 0 : i32
    %c0_i32_1 = arith.constant 0 : i32
    return %c0_i32, %c0_i32_0 : i32, i32
  }
  func.func @transform_17(%arg0: i32, %arg1: i32) -> (i32, i32) {
    %c0_i32 = arith.constant 0 : i32
    %c0_i32_0 = arith.constant 0 : i32
    %c0_i32_1 = arith.constant 0 : i32
    return %c0_i32, %c0_i32_0 : i32, i32
  }
  func.func @transform_18(%arg0: i32, %arg1: i32) -> (i32, i32) {
    %c0_i32 = arith.constant 0 : i32
    %c0_i32_0 = arith.constant 0 : i32
    %c0_i32_1 = arith.constant 0 : i32
    return %c0_i32, %c0_i32_0 : i32, i32
  }
  func.func @transform_19(%arg0: i32, %arg1: i32) -> (i32, i32, i32) {
    %c0_i32 = arith.constant 0 : i32
    %c0_i32_0 = arith.constant 0 : i32
    %c0_i32_1 = arith.constant 0 : i32
    return %arg0, %c0_i32, %c0_i32_0 : i32, i32, i32
  }
}

</mosaic_0001>

<bundles_post_ra>
// kernel: tpu_custom_call.1
= control target key start
LH: loop header
LB: loop body
LE: loop exit
PB: predicated region body
PF: predicated region fallthrough
CT: control target
= control target key end

     0   :  { %s3083_s0 = inlined_call_operand.vmem [shape: f32[2,2], index: 0, kind: input, shape index: {}]   ;;  %s3084_s1 = inlined_call_operand.vmem [shape: f32[2,32,128], index: 1, kind: input, shape index: {}]   ;;  %s3085_s2 = inlined_call_operand.vmem [shape: f32[2,32,1], index: 2, kind: input, shape index: {}]   ;;  %s3086_s3 = inlined_call_operand.vmem [shape: f32[2,1,128], index: 3, kind: input, shape index: {}]   ;;  %s3087_s4 = inlined_call_operand.vmem [shape: f32[2,16,128], index: 4, kind: input, shape index: {}]   ;;  %s3088_s5 = inlined_call_operand.vmem [shape: f32[16,1], index: 5, kind: input, shape index: {}]   ;;  %s3089_s6 = inlined_call_operand.vmem [shape: f32[16,1], index: 6, kind: input, shape index: {}]   ;;  %s3090_s7 = inlined_call_operand.vmem [shape: f32[2,16,128], index: 7, kind: input, shape index: {}]   ;;  %s3091_s8 = inlined_call_operand.vmem [shape: f32[2,4,32,1], index: 8, kind: input, shape index: {}]   ;;  %s3092_s9 = inlined_call_operand.vmem [shape: f32[32,16], index: 9, kind: input, shape index: {}]   ;;  %s3093_s10 = inlined_call_operand.vmem [shape: f32[32,1], index: 10, kind: input, shape index: {}]   ;;  %s3094_s11 = inlined_call_operand.vmem [shape: f32[4,64,128], index: 11, kind: input, shape index: {}]   ;;  %s3095_s12 = inlined_call_operand.vmem [shape: f32[4,64,1], index: 12, kind: input, shape index: {}]   ;;  %s3096_s13 = inlined_call_operand.vmem [shape: f32[4,64,32], index: 13, kind: input, shape index: {}]   ;;  %s3097_s14 = inlined_call_operand.vmem [shape: f32[4,64,1], index: 14, kind: input, shape index: {}]   ;;  %s3098_s15 = inlined_call_operand.vmem [shape: f32[32,32], index: 15, kind: input, shape index: {}]   ;;  %s3099_s16 = inlined_call_operand.vmem [shape: f32[32,1], index: 16, kind: input, shape index: {}]   ;;  %s3100_s17 = inlined_call_operand.vmem [shape: f32[16,32], index: 17, kind: input, shape index: {}]   ;;  %s3101_s18 = inlined_call_operand.vmem [shape: f32[16,1], index: 18, kind: input, shape index: {}]   ;;  %s3102_s19 = inlined_call_operand.hbm [shape: f32[2,1,128], index: 19, kind: output, shape index: {}]  }
   0x1   :  { %3122 = sst [smem:[#allocation23_spill]] %s3083_s0 }
   0x2   :  { %3123 = sst [smem:[#allocation24_spill]] %s3084_s1 }
   0x3   :  { %3124 = sst [smem:[#allocation25_spill]] %s3085_s2 }
   0x4   :  { %3125 = sst [smem:[#allocation26_spill]] %s3086_s3 }
   0x5   :  { %3126 = sst [smem:[#allocation27_spill]] %s3087_s4 }
   0x6   :  { %3127 = sst [smem:[#allocation28_spill]] %s3088_s5 }
   0x7   :  { %3128 = sst [smem:[#allocation29_spill]] %s3092_s9 }
   0x8   :  { %3129 = sst [smem:[#allocation30_spill]] %s3093_s10 }
   0x9   :  { %3130 = sst [smem:[#allocation31_spill]] %s3098_s15 }
   0xa   :  { %3131 = sst [smem:[#allocation32_spill]] %s3099_s16 }
   0xb   :  { %3132 = sst [smem:[#allocation33_spill]] %s3100_s17 }
   0xc   :  { %3133 = sst [smem:[#allocation34_spill]] %s3101_s18 }
   0xd   :  { %3134 = sst [smem:[#allocation35_spill]] %s3102_s19 }
   0xe   :  { %24 = vsyncpa [#allocation7], 0 }
   0xf   :  { %25 = vsyncpa [#allocation6], 0 }
  0x10   :  { %27 = vsyncpa [#allocation6 + $0x1], 0  ;;  %s2682_s0 = smov 0   ;;  %s2684_s30 = smov 0  }
  0x11   :  { %s2686_s20 = smov 0   ;;  %s2688_s21 = smov 0  }
  0x12   :  { %s2690_s1 = smov 0   ;;  %s2692_s22 = smov 0  }
  0x13   :  { %s2694_s2 = smov 0   ;;  %s2696_s23 = smov 0  }
  0x14 LB: > { %3135 = sst [smem:[#allocation11_spill]] %s2542_s0  ;;  %s2050_s24 = sadd.s32 4294967295, %s2570_s23   ;;  %s2570_s23 = sphi %s2696_s23, %s33_s23   ;;  %s2566_s2 = sphi %s2694_s2, %s3184_s2   ;;  %s2562_s22 = sphi %s2692_s22, %s3187_s22   ;;  %s2558_s1 = sphi %s2690_s1, %s3182_s1   ;;  %s2554_s21 = sphi %s2688_s21, %s3181_s21   ;;  %s2550_s20 = sphi %s2686_s20, %s3180_s20   ;;  %s2546_s30 = sphi %s2684_s30, %s3186_s30   ;;  %s2542_s0 = sphi %s2682_s0, %s3185_s0  }
  0x15   : > { %3136 = sst [smem:[#allocation12_spill]] %s2550_s20  ;;  %s2051_s25 = sadd.s32 4294967294, %s2570_s23  }
  0x16   : > { %3137 = sst [smem:[#allocation13_spill]] %s2558_s1  ;;  %s42_s3 = sadd.s32 1, %s2562_s22 }
  0x17   : > { %3138 = sst [smem:[#allocation14_spill]] %s2562_s22  ;;  %s45_s26 = sadd.s32 1, %s2566_s2 }
  0x18   : > { %3139 = sst [smem:[#allocation15_spill]] %s2566_s2  ;;  %p43_p0 = scmp.ge.s32.totalorder %s42_s3, 4 }
  0x19   : > { %3140 = sst [smem:[#allocation16_spill]] %s2570_s23  ;;  %s503_s27 = sadd.s32 1, %s2550_s20 }
  0x1a   : > { %p513_p1 = scmp.ne.s32.totalorder %s2550_s20, %s2546_s30  ;;  %p514_p2 = scmp.eq.s32.totalorder %s2050_s24, 7 }
  0x1b   : > { %s3189_s3 = smov (%p43_p0, %s42_s3), 0  ;;  %s3191_s26 = smov (!%p43_p0, %s45_s26), %s2566_s2 }
  0x1c   : > { %3141 = sst [smem:[#allocation17_spill]] %s3189_s3  ;;  %p2732_p3 = por %p514_p2, %p513_p1 }
  0x1d   : > { %p519_p4 = scmp.ne.s32.totalorder %s2546_s30, %s2542_s0  ;;  %p47_p5 = scmp.ge.s32.totalorder %s3191_s26, 2 }
  0x1e   : > { %s3142_s28 = scalar_select %p2732_p3, 1, 0 }
  0x1f   : > { %p520_p6 = scmp.eq.s32.totalorder %s2051_s25, 7  ;;  %p2052_p7 = scmp.ge.s32.totalorder %s2570_s23, 1 }
  0x20   : > { %3143 = sst [smem:[#allocation18_spill]] %s3142_s28  ;;  %p527_p8 = scmp.lt.s32.totalorder %s2570_s23, 9 }
  0x21   : > { %s3193_s26 = smov (%p47_p5, %s3191_s26), 0  ;;  %p2742_p9 = por %p520_p6, %p519_p4 }
  0x22   : > { %3144 = sst [smem:[#allocation19_spill]] %s3193_s26  ;;  %p2746_p10 = pnand %p2052_p7, %p527_p8 }
  0x23   : > { %s3145_s29 = scalar_select %p2742_p9, 1, 0 }
  0x24   : > { %s500_s22 = ssub.s32 %s2566_s2, %s3193_s26  ;;  %p2341_p12 = pneg %p2746_p10 }
  0x25   : > { %3146 = sst [smem:[#allocation20_spill]] %s3145_s29  ;;  %p501_p11 = scmp.eq.s32.totalorder %s500_s22, 0 }
  0x26   : > { %p2754_p13 = scmp.eq.s32.totalorder %s2050_s24, 0  ;;  %s3149_s19 = sld [smem:[#allocation23_spill]] }
  0x27   : > { %s2762_s17 = scalar_select %p501_p11, %s2550_s20, %s503_s27  }
  0x28   : > { %p2342_p0 = pnand %p2754_p13, %p2341_p12 }
  0x29   : > { %3150 = sst [smem:[#allocation21_spill]] %s2762_s17 }
  0x2a   : > { %p2459_p2 = pneg %p2342_p0 }
  0x2c   : > { %s540_s28 = sshll.u32 %s3149_s19, 4  ;;  %s541_s28 = int_to_ptr.vmem [resolvable:$true] %s540_s28 }
  0x2d   : > { %s2457_s29 = scalar_lea.vmem %s541_s28, 32  ;;  %p2465_p6 = scmp.lt.s32.totalorder %s541_s28, %s541_s28 }
  0x2e   : > { %p2458_p1 = scmp.ne.s32.totalorder %s541_s28, %s2457_s29  ;;  %p2466_p7 = scmp.lt.s32.totalorder %s2457_s29, %s2457_s29 }
  0x30   : > { %p2460_p4 = pnand %p2459_p2, %p2458_p1  ;;  %p2467_p8 = por %p2466_p7, %p2465_p6 }
  0x32   : > { %p2461_p5 = pneg %p2460_p4 }
  0x34   : > { %p2468_p9 = pnand %p2467_p8, %p2461_p5 }
  0x36   : > { %2471 = shalt.err (!%p2468_p9)
}
  0x37   : > { %s2572_s22 = smov [#allocation5]   ;;  %659 = sbr.rel (%p2746_p10) target bundleno = 1863 (0x747), region = 96 }
  0x38   : > { %2344 = dma.vmem_to_smem (!%p2342_p0), %s541_s28, 32, %s2572_s22, [#allocation7]  }
  0x3e   : > { %2533 = dma.done.wait (%p2754_p13), [#allocation7], 32  }
  0x3f   : > { %2535 = vsyncadd (%p2754_p13), [#allocation7], 4294967264 }
  0x40   : > { %665 = sfence }
  0x41   : > { %p762_p11 = scmp.lt.s32.totalorder %s2558_s1, 1  ;;  %p787_p9 = scmp.lt.s32.totalorder %s2554_s21, 3 }
  0x42   : > { %s3152_s26 = sld [smem:[#allocation24_spill]]  ;;  %s3154_s20 = sld [smem:[#allocation25_spill]] }
  0x43   : > { %s2776_s0 = scalar_select %p762_p11, %s2558_s1, 1 }
  0x44   : > { %s788_s23 = scalar_select %p787_p9, %s2554_s21, 3 }
  0x45   : > { %s2110_s24 = sshll.u32 %s2776_s0, 5  ;;  %s2112_s16 = sshll.u32 %s2776_s0, 4 }
  0x46   : > { %s2065_s15 = sshll.u32 %s788_s23, 2  ;;  %s3155_s4 = sld [smem:[#allocation27_spill]] }
  0x47   : > { %s2803_s28 = scalar_lea.vmem %s3090_s7, %s2112_s16  ;;  %s791_s25 = sadd.s32 %s2112_s16, %s2065_s15 }
  0x48   : > { %s2787_s2 = scalar_lea.vmem %s3152_s26, %s2110_s24  ;;  %s2792_s18 = scalar_lea.vmem %s3154_s20, %s2110_s24 }
  0x49   : > { %3153 = sst [smem:[#allocation22_spill]] %s2787_s2  ;;  %s2114_s26 = sshll.u32 %s788_s23, 6 }
  0x4a   : > { %s2067_s22 = sshll.u32 %s791_s25, 3  ;;  %s2808_s17 = scalar_lea.vmem %s3094_s11, %s2114_s26 }
  0x4b   : > { %s2813_s24 = scalar_lea.vmem %s3091_s8, %s2067_s22  ;;  %s2823_s15 = scalar_lea.vmem %s3096_s13, %s2114_s26 }
  0x4c   : > { %s2798_s1 = scalar_lea.vmem %s3155_s4, %s2112_s16  ;;  %s2818_s4 = scalar_lea.vmem %s3095_s12, %s2114_s26 }
  0x4d   : > { %s2828_s2 = scalar_lea.vmem %s3097_s14, %s2114_s26  ;;  %s3156_s29 = sand.u32 1, %s2546_s30  }
  0x4e   : > { %s2832_s25 = scalar_lea.vmem [#allocation8], %s3156_s29  ;;  %p2076_p10 = scmp.ne.s32.totalorder %s2554_s21, 0 }
  0x4f   : > { %v881_v0 = vld [vmem:[%s3089_s6] sm:$0xff] (!%p2076_p10)  ;;  %s3157_s5 = sld [smem:[#allocation28_spill]] (!%p2076_p10)  ;;  %v2573_v2 = vmov (!%p2076_p10), 0   ;;  %v882_v3 = vld [vmem:[%s3089_s6 + $0x8] sm:$0xff] (!%p2076_p10)  ;;  %v825_v7 = vld [vmem:[%s2792_s18 + $0x18] sm:$0xff] (!%p2076_p10)  ;;  %s3158_s16 = sld [smem:[#allocation13_spill]] (!%p2076_p10) }
  0x50   : > { %817 = sbr.rel (%p2076_p10) target bundleno = 450 (0x1c2), region = 104  ;;  %2426 = vset.pattern.permute.xlu1 (!%p2076_p10), %v2573_v2  ;;  %2425 = vset.pattern.permute.xlu0 (!%p2076_p10), %v2573_v2  ;;  %v823_v5 = vld [vmem:[%s2792_s18 + $0x8] sm:$0xff] (!%p2076_p10)  ;;  %v822_v6 = vld [vmem:[%s2792_s18] sm:$0xff] (!%p2076_p10)  ;;  %v824_v8 = vld [vmem:[%s2792_s18 + $0x10] sm:$0xff] (!%p2076_p10)  ;;  %s3159_s22 = sld [smem:[#allocation30_spill]] (!%p2076_p10)  ;;  %vm937_vm0 = vcmask (!%p2076_p10), 130048  }
  0x51   : > { %885 = vperm.xlu1 (!%p2076_p10), %2426, %v881_v0   ;;  %s3161_s3 = sld [smem:[#allocation29_spill]] (!%p2076_p10)  ;;  %s3162_s26 = sld [smem:[#allocation22_spill]] (!%p2076_p10)  ;;  %v865_v15 = vld [vmem:[%s2798_s1] sm:$0xff] (!%p2076_p10)  ;;  %v866_v19 = vld [vmem:[%s2798_s1 + $0x8] sm:$0xff] (!%p2076_p10)  ;;  %v2574_v55 = vmov (!%p2076_p10), 0.0  }
  0x52   : > { %v902_v22 = vld [vmem:[%s2803_s28] sm:$0xff] (!%p2076_p10)  ;;  %v903_v25 = vld [vmem:[%s2803_s28 + $0x8] sm:$0xff] (!%p2076_p10)  ;;  %s3163_s27 = sld [smem:[#allocation26_spill]] (!%p2076_p10)  ;;  %1043 = vst [vmem:[#allocation4] sm:$0xff] (!%p2076_p10), %v2574_v55  ;;  %1044 = vst [vmem:[#allocation4 + $0x8] sm:$0xff] (!%p2076_p10), %v2574_v55 }
  0x53   : > { %1045 = vst [vmem:[#allocation4 + $0x10] sm:$0xff] (!%p2076_p10), %v2574_v55  ;;  %1046 = vst [vmem:[#allocation4 + $0x18] sm:$0xff] (!%p2076_p10), %v2574_v55 }
  0x55   : > { %v867_v1 = vld [vmem:[%s3157_s5] sm:$0xff] (!%p2076_p10)  ;;  %v868_v4 = vld [vmem:[%s3157_s5 + $0x8] sm:$0xff] (!%p2076_p10)  ;;  %890 = vperm.xlu1 (!%p2076_p10), %2426, %v882_v3   ;;  %s2078_s20 = sshll.u32 (!%p2076_p10), %s3158_s16, 7 }
  0x56   : > { %871 = vperm.xlu0 (!%p2076_p10), %2425, %v867_v1   ;;  %s3160_s19 = smov (!%p2076_p10), %s3159_s22  ;;  %v914_v9 = vld [vmem:[%s3159_s22 + $0x8] sm:$0xff] (!%p2076_p10)  ;;  %s900_s9 = sadd.s32 (!%p2076_p10), 1, %s2078_s20 }
  0x57   : > { %v913_v10 = vld [vmem:[%s3160_s19] sm:$0xff]  ;;  %v911_v12 = vld [vmem:[%s3161_s3 + $0x10] sm:$0xff]  ;;  %v916_v13 = vld [vmem:[%s3160_s19 + $0x18] sm:$0xff]  ;;  %s896_s10 = sld [smem:[#allocation5 + %s2078_s20]] }
  0x58   : > { %v909_v11 = vld [vmem:[%s3161_s3] sm:$0xff]  ;;  %v915_v14 = vld [vmem:[%s3160_s19 + $0x10] sm:$0xff]  ;;  %2181 = vmatprep.mubr.msk.f32.mxu1 %vm937_vm0, %v911_v12  ;;  %s901_s18 = sld [smem:[#allocation5 + %s900_s9]]  ;;  %v819_v28 = vld [vmem:[%s3162_s26 + $0x8] sm:$0xff]  ;;  %s3164_s1 = scalar_lea.vmem %s3163_s27, %s2776_s0 }
  0x59   : > { %833 = vperm.xlu1 %2426, %v823_v5   ;;  %2178 = vmatprep.mubr.msk.f32.mxu0 %vm937_vm0, %v909_v11  ;;  %v818_v29 = vld [vmem:[%s3162_s26] sm:$0xff]  ;;  %v821_v40 = vld [vmem:[%s3162_s26 + $0x18] sm:$0xff]  ;;  %v820_v41 = vld [vmem:[%s3162_s26 + $0x10] sm:$0xff] }
  0x5a   : > { %876 = vperm.xlu0 %2425, %v868_v4   ;;  %v2077_v34 = vld [vmem:[%s3164_s1] ss:$0 sm:$0xff]  ;;  %v910_v53 = vld [vmem:[%s3161_s3 + $0x8] sm:$0xff]  ;;  %v912_v54 = vld [vmem:[%s3161_s3 + $0x18] sm:$0xff] }
  0x5d   : > { %843 = vperm.xlu1 %2426, %v825_v7   ;;  %v897_v21 = vstv %s896_s10 }
  0x5e   : > { %828 = vperm.xlu0 %2425, %v822_v6   ;;  %v904_v23 = vstv %s901_s18 }
  0x5f   : > { %v905_v30 = vmul.f32 %v904_v23, %v902_v22  ;;  %v906_v32 = vmul.f32 %v904_v23, %v903_v25 }
  0x61   : > { %924 = vperm.xlu1 %2426, %v914_v9  }
  0x62   : > { %838 = vperm.xlu0 %2425, %v824_v8  }
  0x65   : > { %934 = vperm.xlu1 %2426, %v916_v13  }
  0x66   : > { %919 = vperm.xlu0 %2425, %v913_v10  }
  0x6a   : > { %929 = vperm.xlu0 %2425, %v915_v14  }
  0xd0   : > { %v886_v16 = vpop.permute.xlu1 %885 }
  0xd4   : > { %v891_v24 = vpop.permute.xlu1 %890 }
  0xd5   : > { %v872_v17 = vpop.permute.xlu0 %871 }
  0xd6   : > { %v879_v18 = vmul.f32 %v872_v17, %v865_v15 }
  0xd8   : > { %v893_v20 = vadd.f32 %v886_v16, %v879_v18  ;;  %v834_v35 = vpop.permute.xlu1 %833 }
  0xd9   : > { %v877_v26 = vpop.permute.xlu0 %876  ;;  %v847_v38 = vadd.f32 %v834_v35, %v819_v28 }
  0xda   : > { %v880_v27 = vmul.f32 %v877_v26, %v866_v19  ;;  %v898_v31 = vmul.f32 %v897_v21, %v893_v20 }
  0xdb   : > { %v858_v44 = vmul.f32 %v2077_v34, %v847_v38 }
  0xdc   : > { %v894_v33 = vadd.f32 %v891_v24, %v880_v27  ;;  %v907_v42 = vadd.f32 %v905_v30, %v898_v31  ;;  %v844_v46 = vpop.permute.xlu1 %843 }
  0xdd   : > { %v829_v36 = vpop.permute.xlu0 %828  ;;  %862 = vst [vmem:[#allocation2 + $0x68] sm:$0xff] %v858_v44  ;;  %v849_v48 = vadd.f32 %v844_v46, %v821_v40 }
  0xde   : > { %v899_v37 = vmul.f32 %v897_v21, %v894_v33  ;;  %v846_v39 = vadd.f32 %v829_v36, %v818_v29 }
  0xdf   : > { %v860_v51 = vmul.f32 %v2077_v34, %v849_v48 }
  0xe0   : > { %v908_v43 = vadd.f32 %v906_v32, %v899_v37  ;;  %v857_v45 = vmul.f32 %v2077_v34, %v846_v39  ;;  %v925_v56 = vpop.permute.xlu1 %924 }
  0xe1   : > { %v839_v47 = vpop.permute.xlu0 %838  ;;  %864 = vst [vmem:[#allocation2 + $0x78] sm:$0xff] %v860_v51 }
  0xe2   : > { %861 = vst [vmem:[#allocation2 + $0x60] sm:$0xff] %v857_v45  ;;  %v848_v49 = vadd.f32 %v839_v47, %v820_v41  ;;  %v2273_v50 = vpack.c.bf16 %v908_v43, %v907_v42 }
  0xe4   : > { %v859_v52 = vmul.f32 %v2077_v34, %v848_v49  ;;  %2274 = vmatprep.subr.bf16.mxu0 %v2273_v50  ;;  %2333 = vmatprep.subr.bf16.mxu1 %v2273_v50  ;;  %v935_v58 = vpop.permute.xlu1 %934 }
  0xe5   : > { %2276 = vmatpush3.bf16.msra.mxu0 %v2273_v50  ;;  %2334 = vmatpush3.bf16.msra.mxu1 %v2273_v50  ;;  %v920_v57 = vpop.permute.xlu0 %919 }
  0xe6   : > { %863 = vst [vmem:[#allocation2 + $0x70] sm:$0xff] %v859_v52 }
  0xe8   : > { %2179 = vmatmul.mubr.msk.f32.vlgmr.msra.gmra.mrb[0].mxu0 %vm937_vm0, %v910_v53  ;;  %2182 = vmatmul.mubr.msk.f32.vlgmr.msra.gmra.mrb[0].mxu1 %vm937_vm0, %v912_v54 }
  0xe9   : > { %v930_v59 = vpop.permute.xlu0 %929 }
 0x1bb   : > { %v2180_v60 = vpop.f32.mrb[0].mxu0  ;;  %v2183_v61 = vpop.f32.mrb[0].mxu1 }
 0x1bc   : > { %v1022_v62 = vadd.f32 %v2180_v60, %v925_v56  ;;  %v1032_v63 = vadd.f32 %v2183_v61, %v935_v58  ;;  %v1016_v0 = vpop.f32.mrb[1].mxu0  ;;  %v1026_v1 = vpop.f32.mrb[1].mxu1 }
 0x1bd   : > { %v1017_v2 = vadd.f32 %v1016_v0, %v920_v57  ;;  %v1027_v3 = vadd.f32 %v1026_v1, %v930_v59 }
 0x1be   : > { %v1036_v4 = vmax.f32 %v1022_v62, 0.0  ;;  %v1038_v5 = vmax.f32 %v1032_v63, 0.0 }
 0x1bf   : > { %v1035_v6 = vmax.f32 %v1017_v2, 0.0  ;;  %v1037_v7 = vmax.f32 %v1027_v3, 0.0 }
 0x1c0   : > { %1040 = vst [vmem:[#allocation3 + $0x8] sm:$0xff] %v1036_v4  ;;  %1042 = vst [vmem:[#allocation3 + $0x18] sm:$0xff] %v1038_v5 }
 0x1c1   : > { %1039 = vst [vmem:[#allocation3] sm:$0xff] %v1035_v6  ;;  %1041 = vst [vmem:[#allocation3 + $0x10] sm:$0xff] %v1037_v7 }
 0x1c2 PF: > { %v1053_v8 = vld [vmem:[%s2813_s24 + $0x10] sm:$0xff]  ;;  %v1051_v9 = vld [vmem:[%s2813_s24] sm:$0xff]  ;;  %v2575_v10 = vmov 0   ;;  %s1091_s20 = ssub.s32 0, %s2554_s21  ;;  %v1054_v11 = vld [vmem:[%s2813_s24 + $0x18] sm:$0xff]  ;;  %p1090_p12 = scmp.lt.s32.totalorder %s2554_s21, 0  ;;  %v1079_v13 = vlaneseq }
 0x1c3   : > { %2428 = vset.pattern.permute.xlu1 %v2575_v10  ;;  %2427 = vset.pattern.permute.xlu0 %v2575_v10  ;;  %s2083_s9 = smin.u32 %s2554_s21, %s1091_s20  ;;  %v1052_v12 = vld [vmem:[%s2813_s24 + $0x8] sm:$0xff] }
 0x1c4   : > { %1067 = vperm.xlu1 %2428, %v1053_v8   ;;  %1057 = vperm.xlu0 %2427, %v1051_v9   ;;  %s1093_s26 = sand.u32 1, %s2083_s9   ;;  %v2904_v14 = vand.u32 127, %v1079_v13 }
 0x1c5   : > { %s1094_s10 = ssub.s32 0, %s1093_s26 }
 0x1c6   : > { %s3195_s10 = smov (!%p1090_p12, %s1094_s10), %s1093_s26  ;;  %vm1081_vm1 = vcmp.lt.s32.totalorder %v2904_v14, 16 }
 0x1c7   : > { %p2085_p13 = scmp.lt.s32.totalorder %s3195_s10, 0  ;;  %s1100_s18 = sadd.s32 2, %s3195_s10  ;;  %v2913_v21 = vld [vmem:[#allocation3 + $0x18] sm:$0xff]  ;;  %v2915_v22 = vld [vmem:[#allocation3 + $0x8] sm:$0xff] }
 0x1c8   : > { %1072 = vperm.xlu1 %2428, %v1054_v11   ;;  %1062 = vperm.xlu0 %2427, %v1052_v12   ;;  %v2906_v15 = vld [vmem:[#allocation3 + $0x10] sm:$0xff]  ;;  %v2908_v16 = vld [vmem:[#allocation3] sm:$0xff] }
 0x1c9   : > { %s3197_s18 = smov (!%p2085_p13, %s1100_s18), %s3195_s10 }
 0x1ca   : > { %p2086_p0 = scmp.ne.s32.totalorder %s3197_s18, 0 }
 0x1cb   : > { %s2576_s24 = smov (!%p2086_p0), 1   ;;  %s2577_s5 = smov (!%p2086_p0), 127   ;;  %vm1106_vm2 = vcmp.ge.s32.totalorder (!%p2086_p0), %v2904_v14, 1  ;;  %vm1123_vm3 = vcmp.lt.s32.totalorder (!%p2086_p0), %v2904_v14, 127 }
 0x243   : > { %v1068_v17 = vpop.permute.xlu1 %1067  ;;  %v1058_v18 = vpop.permute.xlu0 %1057 }
 0x244   : > { %v1077_v19 = vadd.f32 %v1068_v17, %v2906_v15  ;;  %v1075_v20 = vadd.f32 %v1058_v18, %v2908_v16 }
 0x245   : > { %1105 = sbr.rel (%p2086_p0) target bundleno = 712 (0x2c8), region = 108 }
 0x246   : > { %v1084_v23 = vsel %vm1081_vm1, %v1077_v19, 0.0  ;;  %v1082_v24 = vsel %vm1081_vm1, %v1075_v20, 0.0 }
 0x247   : > { %1088 = vst [vmem:[#allocation2 + $0x30] sm:$0xff] %v1084_v23  ;;  %1086 = vst [vmem:[#allocation2 + $0x20] sm:$0xff] %v1082_v24  ;;  %v1073_v25 = vpop.permute.xlu1 %1072  ;;  %v1063_v26 = vpop.permute.xlu0 %1062  ;;  %1111 = vrot.lane.b32.xlu1 (!%p2086_p0), %v1084_v23, %s2576_s24  ;;  %1107 = vrot.lane.b32.xlu0 (!%p2086_p0), %v1082_v24, %s2576_s24 }
 0x248   : > { %v1078_v27 = vadd.f32 %v1073_v25, %v2913_v21  ;;  %v1076_v28 = vadd.f32 %v1063_v26, %v2915_v22 }
 0x24a   : > { %v1085_v29 = vsel %vm1081_vm1, %v1078_v27, 0.0  ;;  %v1083_v30 = vsel %vm1081_vm1, %v1076_v28, 0.0 }
 0x24b   : > { %1089 = vst [vmem:[#allocation2 + $0x38] sm:$0xff] %v1085_v29  ;;  %1087 = vst [vmem:[#allocation2 + $0x28] sm:$0xff] %v1083_v30  ;;  %1113 = vrot.lane.b32.xlu1 (!%p2086_p0), %v1085_v29, %s2576_s24  ;;  %1109 = vrot.lane.b32.xlu0 (!%p2086_p0), %v1083_v30, %s2576_s24 }
 0x24f   : > { %1126 = vrot.lane.b32.xlu1 %v1083_v30, %s2577_s5  ;;  %1124 = vrot.lane.b32.xlu0 %v1082_v24, %s2577_s5 }
 0x253   : > { %1130 = vrot.lane.b32.xlu1 %v1085_v29, %s2577_s5  ;;  %1128 = vrot.lane.b32.xlu0 %v1084_v23, %s2577_s5 }
 0x2b9   : > { %v1112_v31 = vpop.permute.xlu1 %1111  ;;  %v1108_v32 = vpop.permute.xlu0 %1107 }
 0x2ba   : > { %v1117_v33 = vsel %vm1106_vm2, %v1112_v31, 0.0  ;;  %v1115_v34 = vsel %vm1106_vm2, %v1108_v32, 0.0 }
 0x2bb   : > { %1121 = vst [vmem:[#allocation2 + $0x10] sm:$0xff] %v1117_v33  ;;  %1119 = vst [vmem:[#allocation2] sm:$0xff] %v1115_v34 }
 0x2bd   : > { %v1114_v35 = vpop.permute.xlu1 %1113  ;;  %v1110_v36 = vpop.permute.xlu0 %1109 }
 0x2be   : > { %v1118_v37 = vsel %vm1106_vm2, %v1114_v35, 0.0  ;;  %v1116_v38 = vsel %vm1106_vm2, %v1110_v36, 0.0 }
 0x2bf   : > { %1122 = vst [vmem:[#allocation2 + $0x18] sm:$0xff] %v1118_v37  ;;  %1120 = vst [vmem:[#allocation2 + $0x8] sm:$0xff] %v1116_v38 }
 0x2c1   : > { %v1127_v39 = vpop.permute.xlu1 %1126  ;;  %v1125_v40 = vpop.permute.xlu0 %1124 }
 0x2c2   : > { %v1133_v41 = vsel %vm1123_vm3, %v1127_v39, 0.0  ;;  %v1132_v42 = vsel %vm1123_vm3, %v1125_v40, 0.0 }
 0x2c3   : > { %1137 = vst [vmem:[#allocation2 + $0x48] sm:$0xff] %v1133_v41  ;;  %1136 = vst [vmem:[#allocation2 + $0x40] sm:$0xff] %v1132_v42 }
 0x2c5   : > { %v1131_v43 = vpop.permute.xlu1 %1130  ;;  %v1129_v44 = vpop.permute.xlu0 %1128 }
 0x2c6   : > { %v1135_v45 = vsel %vm1123_vm3, %v1131_v43, 0.0  ;;  %v1134_v46 = vsel %vm1123_vm3, %v1129_v44, 0.0 }
 0x2c7   : > { %1139 = vst [vmem:[#allocation2 + $0x58] sm:$0xff] %v1135_v45  ;;  %1138 = vst [vmem:[#allocation2 + $0x50] sm:$0xff] %v1134_v46 }
 0x2c8 PF: > { %p2087_p1 = scmp.ne.s32.totalorder %s3197_s18, 1 }
 0x2c9   : > { %s2578_s16 = smov (!%p2087_p1), 2   ;;  %s2579_s27 = smov (!%p2087_p1), 126   ;;  %vm1144_vm4 = vcmp.ge.s32.totalorder (!%p2087_p1), %v2904_v14, 2  ;;  %vm1161_vm5 = vcmp.lt.s32.totalorder (!%p2087_p1), %v2904_v14, 126 }
 0x2ca   : > { %1143 = sbr.rel (%p2087_p1) target bundleno = 843 (0x34b), region = 112  ;;  %1149 = vrot.lane.b32.xlu1 (!%p2087_p1), %v1084_v23, %s2578_s16  ;;  %1145 = vrot.lane.b32.xlu0 (!%p2087_p1), %v1082_v24, %s2578_s16 }
 0x2ce   : > { %1151 = vrot.lane.b32.xlu1 (!%p2087_p1), %v1085_v29, %s2578_s16  ;;  %1147 = vrot.lane.b32.xlu0 (!%p2087_p1), %v1083_v30, %s2578_s16 }
 0x2d2   : > { %1164 = vrot.lane.b32.xlu1 %v1083_v30, %s2579_s27  ;;  %1162 = vrot.lane.b32.xlu0 %v1082_v24, %s2579_s27 }
 0x2d6   : > { %1168 = vrot.lane.b32.xlu1 %v1085_v29, %s2579_s27  ;;  %1166 = vrot.lane.b32.xlu0 %v1084_v23, %s2579_s27 }
 0x33c   : > { %v1150_v47 = vpop.permute.xlu1 %1149  ;;  %v1146_v48 = vpop.permute.xlu0 %1145 }
 0x33d   : > { %v1155_v49 = vsel %vm1144_vm4, %v1150_v47, 0.0  ;;  %v1153_v50 = vsel %vm1144_vm4, %v1146_v48, 0.0 }
 0x33e   : > { %1159 = vst [vmem:[#allocation2 + $0x10] sm:$0xff] %v1155_v49  ;;  %1157 = vst [vmem:[#allocation2] sm:$0xff] %v1153_v50 }
 0x340   : > { %v1152_v51 = vpop.permute.xlu1 %1151  ;;  %v1148_v52 = vpop.permute.xlu0 %1147 }
 0x341   : > { %v1156_v53 = vsel %vm1144_vm4, %v1152_v51, 0.0  ;;  %v1154_v54 = vsel %vm1144_vm4, %v1148_v52, 0.0 }
 0x342   : > { %1160 = vst [vmem:[#allocation2 + $0x18] sm:$0xff] %v1156_v53  ;;  %1158 = vst [vmem:[#allocation2 + $0x8] sm:$0xff] %v1154_v54 }
 0x344   : > { %v1165_v55 = vpop.permute.xlu1 %1164  ;;  %v1163_v56 = vpop.permute.xlu0 %1162 }
 0x345   : > { %v1171_v57 = vsel %vm1161_vm5, %v1165_v55, 0.0  ;;  %v1170_v58 = vsel %vm1161_vm5, %v1163_v56, 0.0 }
 0x346   : > { %1175 = vst [vmem:[#allocation2 + $0x48] sm:$0xff] %v1171_v57  ;;  %1174 = vst [vmem:[#allocation2 + $0x40] sm:$0xff] %v1170_v58 }
 0x348   : > { %v1169_v59 = vpop.permute.xlu1 %1168  ;;  %v1167_v60 = vpop.permute.xlu0 %1166 }
 0x349   : > { %v1173_v61 = vsel %vm1161_vm5, %v1169_v59, 0.0  ;;  %v1172_v62 = vsel %vm1161_vm5, %v1167_v60, 0.0 }
 0x34a   : > { %1177 = vst [vmem:[#allocation2 + $0x58] sm:$0xff] %v1173_v61  ;;  %1176 = vst [vmem:[#allocation2 + $0x50] sm:$0xff] %v1172_v62 }
 0x34b PF: > { %v1186_v63 = vld [vmem:[#allocation2] sm:$0xff]  ;;  %v1187_v0 = vld [vmem:[#allocation2 + $0x8] sm:$0xff]  ;;  %v1188_v1 = vld [vmem:[#allocation2 + $0x10] sm:$0xff]  ;;  %2429 = vset.pattern.permute.xlu0 %v2575_v10  ;;  %2430 = vset.pattern.permute.xlu1 %v2575_v10  ;;  %vm1443_vm6 = vcmask 261120   ;;  %p2100_p2 = scmp.ne.s32.totalorder %s2554_s21, 3 }
 0x34c   : > { %v2277_v2 = vpack.c.bf16 %v1187_v0, %v1186_v63  ;;  %v1189_v3 = vld [vmem:[#allocation2 + $0x18] sm:$0xff]  ;;  %v1190_v5 = vld [vmem:[#allocation2 + $0x20] sm:$0xff]  ;;  %v1191_v6 = vld [vmem:[#allocation2 + $0x28] sm:$0xff]  ;;  %s3166_s0 = sld [smem:[#allocation32_spill]] (!%p2100_p2)  ;;  %s3168_s16 = sld [smem:[#allocation34_spill]] (!%p2100_p2) }
 0x34d   : > { %v2281_v4 = vpack.c.bf16 %v1189_v3, %v1188_v1  ;;  %v2285_v7 = vpack.c.bf16 %v1191_v6, %v1190_v5  ;;  %v1178_v8 = vld [vmem:[%s2808_s17] sm:$0xff]  ;;  %v1192_v9 = vld [vmem:[#allocation2 + $0x30] sm:$0xff]  ;;  %v1193_v11 = vld [vmem:[#allocation2 + $0x38] sm:$0xff]  ;;  %s3169_s22 = sld [smem:[#allocation33_spill]] (!%p2100_p2) }
 0x34e   : > { %2278 = vmatprep.subr.bf16.mxu0 %v2277_v2  ;;  %2216 = vmatprep.mubr.f32.mxu0 %v1178_v8  ;;  %v1202_v12 = vld [vmem:[%s2818_s4] sm:$0xff]  ;;  %v1204_v13 = vld [vmem:[%s2818_s4 + $0x10] sm:$0xff]  ;;  %v2289_v10 = vpack.c.bf16 %v1193_v11, %v1192_v9  ;;  %v1195_v18 = vld [vmem:[#allocation2 + $0x48] sm:$0xff] }
 0x34f   : > { %2280 = vmatpush3.bf16.msra.mxu0 %v2277_v2  ;;  %1212 = vperm.xlu0 %2429, %v1202_v12   ;;  %v1194_v17 = vld [vmem:[#allocation2 + $0x40] sm:$0xff]  ;;  %v1203_v19 = vld [vmem:[%s2818_s4 + $0x8] sm:$0xff]  ;;  %v1205_v20 = vld [vmem:[%s2818_s4 + $0x18] sm:$0xff] }
 0x350   : > { %2282 = vmatprep.subr.bf16.mxu0 %v2281_v4  ;;  %1222 = vperm.xlu1 %2430, %v1204_v13   ;;  %v2293_v23 = vpack.c.bf16 %v1195_v18, %v1194_v17  ;;  %v1206_v26 = vld [vmem:[%s2818_s4 + $0x20] sm:$0xff]  ;;  %v1207_v27 = vld [vmem:[%s2818_s4 + $0x28] sm:$0xff]  ;;  %v1208_v31 = vld [vmem:[%s2818_s4 + $0x30] sm:$0xff] }
 0x351   : > { %v1196_v24 = vld [vmem:[#allocation2 + $0x50] sm:$0xff]  ;;  %v1197_v25 = vld [vmem:[#allocation2 + $0x58] sm:$0xff]  ;;  %v1198_v29 = vld [vmem:[#allocation2 + $0x60] sm:$0xff] }
 0x352   : > { %v2297_v28 = vpack.c.bf16 %v1197_v25, %v1196_v24  ;;  %v1199_v30 = vld [vmem:[#allocation2 + $0x68] sm:$0xff]  ;;  %v1209_v32 = vld [vmem:[%s2818_s4 + $0x38] sm:$0xff]  ;;  %v1200_v34 = vld [vmem:[#allocation2 + $0x70] sm:$0xff]  ;;  %s3167_s29 = smov (!%p2100_p2), %s3166_s0 }
 0x353   : > { %2284 = vmatpush3.bf16.msra.mxu0 %v2281_v4  ;;  %1217 = vperm.xlu0 %2429, %v1203_v19   ;;  %v2301_v33 = vpack.c.bf16 %v1199_v30, %v1198_v29  ;;  %v1201_v35 = vld [vmem:[#allocation2 + $0x78] sm:$0xff]  ;;  %v1395_v36 = vld [vmem:[%s2828_s2] sm:$0xff]  ;;  %v1396_v37 = vld [vmem:[%s2828_s2 + $0x8] sm:$0xff]  ;;  %s3170_s9 = smov (!%p2100_p2), %s3169_s22 }
 0x354   : > { %2286 = vmatprep.subr.bf16.mxu0 %v2285_v7  ;;  %1227 = vperm.xlu1 %2430, %v1205_v20   ;;  %v2305_v38 = vpack.c.bf16 %v1201_v35, %v1200_v34  ;;  %v1397_v39 = vld [vmem:[%s2828_s2 + $0x10] sm:$0xff]  ;;  %v1398_v40 = vld [vmem:[%s2828_s2 + $0x18] sm:$0xff]  ;;  %v1399_v41 = vld [vmem:[%s2828_s2 + $0x20] sm:$0xff] }
 0x355   : > { %v1400_v42 = vld [vmem:[%s2828_s2 + $0x28] sm:$0xff]  ;;  %v1180_v44 = vld [vmem:[%s2808_s17 + $0x10] sm:$0xff]  ;;  %v1402_v46 = vld [vmem:[%s2828_s2 + $0x38] sm:$0xff] }
 0x356   : > { %v1179_v43 = vld [vmem:[%s2808_s17 + $0x8] sm:$0xff]  ;;  %v1401_v45 = vld [vmem:[%s2828_s2 + $0x30] sm:$0xff]  ;;  %v1181_v47 = vld [vmem:[%s2808_s17 + $0x18] sm:$0xff] }
 0x357   : > { %2288 = vmatpush3.bf16.msra.mxu0 %v2285_v7  ;;  %1232 = vperm.xlu0 %2429, %v1206_v26   ;;  %v1182_v48 = vld [vmem:[%s2808_s17 + $0x20] sm:$0xff]  ;;  %v1183_v49 = vld [vmem:[%s2808_s17 + $0x28] sm:$0xff]  ;;  %v1184_v50 = vld [vmem:[%s2808_s17 + $0x30] sm:$0xff] }
 0x358   : > { %2290 = vmatprep.subr.bf16.mxu0 %v2289_v10  ;;  %1237 = vperm.xlu1 %2430, %v1207_v27   ;;  %v1185_v51 = vld [vmem:[%s2808_s17 + $0x38] sm:$0xff]  ;;  %v1387_v52 = vld [vmem:[%s2823_s15] sm:$0xff] }
 0x359   : > { %2236 = vmatprep.mubr.msk.f32.mxu1 %vm1443_vm6, %v1387_v52 }
 0x35b   : > { %2292 = vmatpush3.bf16.msra.mxu0 %v2289_v10  ;;  %1242 = vperm.xlu0 %2429, %v1208_v31  }
 0x35c   : > { %2294 = vmatprep.subr.bf16.mxu0 %v2293_v23  ;;  %1247 = vperm.xlu1 %2430, %v1209_v32  }
 0x35f   : > { %2296 = vmatpush3.bf16.msra.mxu0 %v2293_v23  ;;  %1405 = vperm.xlu0 %2429, %v1395_v36  }
 0x360   : > { %2298 = vmatprep.subr.bf16.mxu0 %v2297_v28  ;;  %1410 = vperm.xlu1 %2430, %v1396_v37  }
 0x363   : > { %2300 = vmatpush3.bf16.msra.mxu0 %v2297_v28  ;;  %1415 = vperm.xlu0 %2429, %v1397_v39  }
 0x364   : > { %2302 = vmatprep.subr.bf16.mxu0 %v2301_v33  ;;  %1420 = vperm.xlu1 %2430, %v1398_v40  }
 0x367   : > { %2304 = vmatpush3.bf16.msra.mxu0 %v2301_v33  ;;  %1425 = vperm.xlu0 %2429, %v1399_v41  }
 0x368   : > { %2306 = vmatprep.subr.bf16.mxu0 %v2305_v38  ;;  %1430 = vperm.xlu1 %2430, %v1400_v42  }
 0x36b   : > { %2308 = vmatpush3.bf16.msra.mxu0 %v2305_v38  ;;  %1435 = vperm.xlu0 %2429, %v1401_v45   ;;  %v1389_v45 = vld [vmem:[%s2823_s15 + $0x10] sm:$0xff] }
 0x36c   : > { %1440 = vperm.xlu1 %2430, %v1402_v46   ;;  %v1390_v46 = vld [vmem:[%s2823_s15 + $0x18] sm:$0xff] }
 0x36e   : > { %2217 = vmatmul.mubr.f32.vlgmr.msra.gmra.mrb[0].mxu0 %v1179_v43 }
 0x36f   : > { %2219 = vmatprep.mubr.f32.mxu0 %v1180_v44  ;;  %v1388_v44 = vld [vmem:[%s2823_s15 + $0x8] sm:$0xff] }
 0x372   : > { %2220 = vmatmul.mubr.f32.gmra.mrb[2].mxu0 %v1181_v47  ;;  %v1391_v47 = vld [vmem:[%s2823_s15 + $0x20] sm:$0xff] }
 0x373   : > { %2222 = vmatprep.mubr.f32.mxu0 %v1182_v48  ;;  %v1392_v48 = vld [vmem:[%s2823_s15 + $0x28] sm:$0xff] }
 0x376   : > { %2223 = vmatmul.mubr.f32.gmra.mrb[4].mxu0 %v1183_v49  ;;  %v1393_v49 = vld [vmem:[%s2823_s15 + $0x30] sm:$0xff] }
 0x377   : > { %2225 = vmatprep.mubr.f32.mxu0 %v1184_v50  ;;  %v1394_v50 = vld [vmem:[%s2823_s15 + $0x38] sm:$0xff]  ;;  %s3165_s15 = sld [smem:[#allocation31_spill]] (!%p2100_p2) }
 0x37a   : > { %2226 = vmatmul.mubr.f32.gmra.mrb[6].mxu0 %v1185_v51 }
 0x3ce   : > { %v1213_v53 = vpop.permute.xlu0 %1212 }
 0x3cf   : > { %v1223_v54 = vpop.permute.xlu1 %1222 }
 0x3d2   : > { %v1218_v55 = vpop.permute.xlu0 %1217 }
 0x3d3   : > { %v1228_v60 = vpop.permute.xlu1 %1227 }
 0x3d6   : > { %v1233_v8 = vpop.permute.xlu0 %1232 }
 0x3d7   : > { %v1238_v6 = vpop.permute.xlu1 %1237 }
 0x3da   : > { %v1243_v19 = vpop.permute.xlu0 %1242 }
 0x3db   : > { %v1248_v17 = vpop.permute.xlu1 %1247 }
 0x3de   : > { %v1406_v52 = vpop.permute.xlu0 %1405 }
 0x3df   : > { %v1411_v51 = vpop.permute.xlu1 %1410 }
 0x441   : > { %v2218_v56 = vpop.f32.mrb[0].mxu0 }
 0x442   : > { %v1322_v57 = vadd.f32 %v2218_v56, %v1218_v55  ;;  %v1316_v58 = vpop.f32.mrb[1].mxu0  ;;  %v1416_v55 = vpop.permute.xlu0 %1415 }
 0x443   : > { %v1317_v59 = vadd.f32 %v1316_v58, %v1213_v53  ;;  %v1421_v53 = vpop.permute.xlu1 %1420 }
 0x444   : > { %v2089_v61 = vmul.f32 -1.442695, %v1322_v57 }
 0x445   : > { %v2088_v62 = vmul.f32 -1.442695, %v1317_v59  ;;  %v2221_v63 = vpop.f32.mrb[2].mxu0 }
 0x446   : > { %2431 = vpow2.f32 %v2089_v61  ;;  %v1332_v0 = vadd.f32 %v2221_v63, %v1228_v60  ;;  %v1326_v1 = vpop.f32.mrb[3].mxu0 }
 0x447   : > { %2433 = vpow2.f32 %v2088_v62  ;;  %v1327_v2 = vadd.f32 %v1326_v1, %v1223_v54  ;;  %v1431_v1 = vpop.permute.xlu1 %1430 }
 0x448   : > { %v2091_v3 = vmul.f32 -1.442695, %v1332_v0 }
 0x449   : > { %v2090_v4 = vmul.f32 -1.442695, %v1327_v2  ;;  %v2224_v5 = vpop.f32.mrb[4].mxu0 }
 0x44a   : > { %2435 = vpow2.f32 %v2091_v3  ;;  %v1336_v7 = vpop.f32.mrb[5].mxu0  ;;  %v1342_v9 = vadd.f32 %v2224_v5, %v1238_v6 }
 0x44b   : > { %2437 = vpow2.f32 %v2090_v4  ;;  %v1337_v12 = vadd.f32 %v1336_v7, %v1233_v8  ;;  %v1426_v4 = vpop.permute.xlu0 %1425  ;;  %v1586_v8 = vld [vmem:[#allocation4 + $0x8] sm:$0xff] }
 0x44c   : > { %2439 = vtanh.f32 %v1342_v9 }
 0x44d   : > { %v2227_v11 = vpop.f32.mrb[6].mxu0  ;;  %2441 = vtanh.f32 %v1337_v12 }
 0x44e   : > { %v1346_v13 = vpop.f32.mrb[7].mxu0  ;;  %v1352_v23 = vadd.f32 %v2227_v11, %v1248_v17  ;;  %v1441_v17 = vpop.permute.xlu1 %1440 }
 0x44f   : > { %v1347_v25 = vadd.f32 %v1346_v13, %v1243_v19 }
 0x450   : > { %v2432_v10 = vpop.eup %2431 }
 0x451   : > { %v2434_v18 = vpop.eup %2433  ;;  %v1368_v20 = vadd.f32 1.0, %v2432_v10 }
 0x452   : > { %v1367_v24 = vadd.f32 1.0, %v2434_v18 }
 0x453   : > { %2443 = vrcp.f32 %v1368_v20  ;;  %v1588_v20 = vld [vmem:[#allocation4 + $0x18] sm:$0xff] }
 0x454   : > { %v2436_v26 = vpop.eup %2435  ;;  %2445 = vrcp.f32 %v1367_v24 }
 0x455   : > { %v2438_v27 = vpop.eup %2437  ;;  %v1370_v28 = vadd.f32 1.0, %v2436_v26  ;;  %2447 = vtanh.f32 %v1352_v23  ;;  %v1436_v23 = vpop.permute.xlu0 %1435 }
 0x456   : > { %v1369_v29 = vadd.f32 1.0, %v2438_v27  ;;  %2449 = vtanh.f32 %v1347_v25  ;;  %v2440_v30 = vpop.eup %2439 }
 0x457   : > { %2451 = vrcp.f32 %v1370_v28  ;;  %v2442_v31 = vpop.eup %2441 }
 0x458   : > { %2453 = vrcp.f32 %v1369_v29 }
 0x45d   : > { %v2444_v32 = vpop.eup %2443 }
 0x45e   : > { %v2446_v33 = vpop.eup %2445  ;;  %v1384_v34 = vmul.f32 %v2444_v32, %v2440_v30 }
 0x45f   : > { %v2448_v35 = vpop.eup %2447  ;;  %v1383_v36 = vmul.f32 %v2446_v33, %v2442_v31  ;;  %v1601_v33 = vld [vmem:[%s3165_s15] sm:$0xff] (!%p2100_p2) }
 0x460   : > { %v2450_v37 = vpop.eup %2449  ;;  %2256 = vmatprep.mubr.msk.f32.mxu0 (!%p2100_p2), %vm1443_vm6, %v1601_v33 }
 0x461   : > { %v2452_v38 = vpop.eup %2451  ;;  %v2309_v39 = vpack.c.bf16 %v1384_v34, %v1383_v36  ;;  %v2580_v34 = vmov (!%p2100_p2), 0   ;;  %v1609_v36 = vld [vmem:[%s3166_s0] sm:$0xff] (!%p2100_p2) }
 0x462   : > { %v2454_v40 = vpop.eup %2453  ;;  %v1386_v41 = vmul.f32 %v2452_v38, %v2448_v35  ;;  %2455 = vset.pattern.permute.xlu0 (!%p2100_p2), %v2580_v34  ;;  %2456 = vset.pattern.permute.xlu1 (!%p2100_p2), %v2580_v34  ;;  %v1610_v38 = vld [vmem:[%s3167_s29 + $0x8] sm:$0xff] (!%p2100_p2) }
 0x463   : > { %2310 = vmatprep.subr.bf16.mxu1 %v2309_v39  ;;  %v1385_v42 = vmul.f32 %v2454_v40, %v2450_v37  ;;  %1615 = vperm.xlu0 (!%p2100_p2), %2455, %v1609_v36   ;;  %v1611_v37 = vld [vmem:[%s3167_s29 + $0x10] sm:$0xff] (!%p2100_p2)  ;;  %v1602_v40 = vld [vmem:[%s3165_s15 + $0x8] sm:$0xff] (!%p2100_p2) }
 0x464   : > { %2312 = vmatpush3.bf16.msra.mxu1 %v2309_v39  ;;  %1625 = vperm.xlu1 (!%p2100_p2), %2456, %v1611_v37   ;;  %v1612_v39 = vld [vmem:[%s3167_s29 + $0x18] sm:$0xff] (!%p2100_p2) }
 0x465   : > { %v2313_v43 = vpack.c.bf16 %v1386_v41, %v1385_v42  ;;  %v1736_v41 = vld [vmem:[%s3168_s16] sm:$0xff] (!%p2100_p2)  ;;  %v1603_v42 = vld [vmem:[%s3165_s15 + $0x10] sm:$0xff] (!%p2100_p2) }
 0x467   : > { %2314 = vmatprep.subr.bf16.mxu1 %v2313_v43  ;;  %1620 = vperm.xlu0 (!%p2100_p2), %2455, %v1610_v38  }
 0x468   : > { %2316 = vmatpush3.bf16.msra.mxu1 %v2313_v43  ;;  %1630 = vperm.xlu1 (!%p2100_p2), %2456, %v1612_v39   ;;  %v1737_v43 = vld [vmem:[%s3168_s16 + $0x8] sm:$0xff] (!%p2100_p2) }
 0x46b   : > { %2237 = vmatmul.mubr.msk.f32.vlgmr.msra.gmra.mrb[0].mxu1 %vm1443_vm6, %v1388_v44  ;;  %1740 = vperm.xlu0 (!%p2100_p2), %2455, %v1736_v41   ;;  %v1604_v44 = vld [vmem:[%s3165_s15 + $0x18] sm:$0xff] (!%p2100_p2) }
 0x46c   : > { %2239 = vmatprep.mubr.msk.f32.mxu1 %vm1443_vm6, %v1389_v45  ;;  %1745 = vperm.xlu1 (!%p2100_p2), %2456, %v1737_v43   ;;  %v1734_v45 = vld [vmem:[%s3169_s22] sm:$0xff] (!%p2100_p2) }
 0x46f   : > { %2240 = vmatmul.mubr.msk.f32.gmra.mrb[2].mxu1 %vm1443_vm6, %v1390_v46 }
 0x470   : > { %2242 = vmatprep.mubr.msk.f32.mxu1 %vm1443_vm6, %v1391_v47 }
 0x473   : > { %2243 = vmatmul.mubr.msk.f32.gmra.mrb[4].mxu1 %vm1443_vm6, %v1392_v48 }
 0x474   : > { %2245 = vmatprep.mubr.msk.f32.mxu1 %vm1443_vm6, %v1393_v49 }
 0x477   : > { %2246 = vmatmul.mubr.msk.f32.gmra.mrb[6].mxu1 %vm1443_vm6, %v1394_v50 }
 0x478   : > { %2270 = vmatprep.mubr.msk.f32.mxu1 (!%p2100_p2), %vm1443_vm6, %v1734_v45 }
 0x4e2   : > { %v1616_v46 = vpop.permute.xlu0 (!%p2100_p2), %1615 }
 0x4e3   : > { %v1626_v47 = vpop.permute.xlu1 (!%p2100_p2), %1625 }
 0x4e6   : > { %v1621_v48 = vpop.permute.xlu0 (!%p2100_p2), %1620 }
 0x53e   : > { %v2238_v54 = vpop.f32.mrb[0].mxu1 }
 0x53f   : > { %v1540_v56 = vadd.f32 %v2238_v54, %v1411_v51  ;;  %v1534_v57 = vpop.f32.mrb[1].mxu1  ;;  %v1631_v54 = vpop.permute.xlu1 (!%p2100_p2), %1630 }
 0x540   : > { %v1535_v58 = vadd.f32 %v1534_v57, %v1406_v52 }
 0x541   : > { %v1574_v59 = vadd.f32 %v1540_v56, %v2915_v22 }
 0x542   : > { %v1573_v60 = vadd.f32 %v1535_v58, %v2908_v16  ;;  %v2241_v61 = vpop.f32.mrb[2].mxu1  ;;  %v1585_v16 = vld [vmem:[#allocation4] sm:$0xff] }
 0x543   : > { %v1578_v62 = vmul.f32 0.70710677, %v1574_v59  ;;  %v1550_v63 = vadd.f32 %v2241_v61, %v1421_v53  ;;  %v1544_v0 = vpop.f32.mrb[3].mxu1 }
 0x544   : > { %v1577_v2 = vmul.f32 0.70710677, %v1573_v60  ;;  %v1545_v3 = vadd.f32 %v1544_v0, %v1416_v55  ;;  %v1735_v0 = vld [vmem:[%s3170_s9 + $0x8] sm:$0xff] (!%p2100_p2) }
 0x545   : > { %1582 = vst [vmem:[#allocation3 + $0x8] sm:$0xff] %v1578_v62  ;;  %v1576_v5 = vadd.f32 %v1550_v63, %v2913_v21 }
 0x546   : > { %1581 = vst [vmem:[#allocation3] sm:$0xff] %v1577_v2  ;;  %v1575_v6 = vadd.f32 %v1545_v3, %v2906_v15  ;;  %v2244_v7 = vpop.f32.mrb[4].mxu1  ;;  %v1587_v15 = vld [vmem:[#allocation4 + $0x10] sm:$0xff]  ;;  %v1830_v3 = vld [vmem:[%s2803_s28 + $0x8] sm:$0xff] (!%p2100_p2) }
 0x547   : > { %v1580_v9 = vmul.f32 0.70710677, %v1576_v5  ;;  %v1560_v22 = vadd.f32 %v2244_v7, %v1431_v1  ;;  %v1554_v11 = vpop.f32.mrb[5].mxu1  ;;  %v1746_v1 = vpop.permute.xlu1 (!%p2100_p2), %1745  ;;  %v1829_v7 = vld [vmem:[%s2803_s28] sm:$0xff] (!%p2100_p2) }
 0x548   : > { %v1579_v12 = vmul.f32 0.70710677, %v1575_v6  ;;  %v1555_v13 = vadd.f32 %v1554_v11, %v1426_v4  ;;  %v1741_v4 = vpop.permute.xlu0 (!%p2100_p2), %1740 }
 0x549   : > { %1584 = vst [vmem:[#allocation3 + $0x18] sm:$0xff] %v1580_v9  ;;  %v1590_v10 = vadd.f32 %v1586_v8, %v1560_v22 }
 0x54a   : > { %1583 = vst [vmem:[#allocation3 + $0x10] sm:$0xff] %v1579_v12  ;;  %v1589_v18 = vadd.f32 %v1585_v16, %v1555_v13  ;;  %v2247_v19 = vpop.f32.mrb[6].mxu1  ;;  %1600 = sbr.rel (%p2100_p2) target bundleno = 1836 (0x72c), region = 116 }
 0x54b   : > { %1594 = vst [vmem:[#allocation4 + $0x8] sm:$0xff] %v1590_v10  ;;  %v1570_v21 = vadd.f32 %v2247_v19, %v1441_v17  ;;  %v1564_v24 = vpop.f32.mrb[7].mxu1 }
 0x54c   : > { %1593 = vst [vmem:[#allocation4] sm:$0xff] %v1589_v18  ;;  %v1565_v25 = vadd.f32 %v1564_v24, %v1436_v23 }
 0x54d   : > { %v1592_v26 = vadd.f32 %v1588_v20, %v1570_v21 }
 0x54e   : > { %v1591_v27 = vadd.f32 %v1587_v15, %v1565_v25 }
 0x54f   : > { %1596 = vst [vmem:[#allocation4 + $0x18] sm:$0xff] %v1592_v26 }
 0x550   : > { %1595 = vst [vmem:[#allocation4 + $0x10] sm:$0xff] %v1591_v27 }
 0x552   : > { %v1606_v29 = vld [vmem:[#allocation4 + $0x8] sm:$0xff] }
 0x553   : > { %v1605_v28 = vld [vmem:[#allocation4] sm:$0xff] }
 0x554   : > { %v2317_v31 = vpack.c.bf16 %v1606_v29, %v1605_v28 }
 0x556   : > { %v1608_v32 = vld [vmem:[#allocation4 + $0x18] sm:$0xff]  ;;  %2318 = vmatprep.subr.bf16.mxu0 %v2317_v31 }
 0x557   : > { %v1607_v30 = vld [vmem:[#allocation4 + $0x10] sm:$0xff]  ;;  %2320 = vmatpush3.bf16.msra.mxu0 %v2317_v31 }
 0x558   : > { %v2321_v35 = vpack.c.bf16 %v1608_v32, %v1607_v30 }
 0x55a   : > { %2322 = vmatprep.subr.bf16.mxu0 %v2321_v35 }
 0x55b   : > { %2324 = vmatpush3.bf16.msra.mxu0 %v2321_v35 }
 0x55e   : > { %2257 = vmatmul.mubr.msk.f32.vlgmr.msra.gmra.mrb[0].mxu0 %vm1443_vm6, %v1602_v40 }
 0x55f   : > { %2259 = vmatprep.mubr.msk.f32.mxu0 %vm1443_vm6, %v1603_v42 }
 0x562   : > { %2260 = vmatmul.mubr.msk.f32.gmra.mrb[2].mxu0 %vm1443_vm6, %v1604_v44 }
 0x631   : > { %v2258_v49 = vpop.f32.mrb[0].mxu0 }
 0x632   : > { %v1717_v50 = vadd.f32 %v2258_v49, %v1621_v48  ;;  %v1711_v51 = vpop.f32.mrb[1].mxu0 }
 0x633   : > { %v1712_v52 = vadd.f32 %v1711_v51, %v1616_v46 }
 0x634   : > { %v1731_v53 = vmax.f32 %v1717_v50, 0.0 }
 0x635   : > { %v1730_v55 = vmax.f32 %v1712_v52, 0.0  ;;  %v2261_v56 = vpop.f32.mrb[2].mxu0 }
 0x636   : > { %v1727_v57 = vadd.f32 %v2261_v56, %v1631_v54  ;;  %v1721_v58 = vpop.f32.mrb[3].mxu0 }
 0x637   : > { %v1722_v59 = vadd.f32 %v1721_v58, %v1626_v47  ;;  %v2325_v60 = vpack.c.bf16 %v1731_v53, %v1730_v55 }
 0x638   : > { %v1733_v61 = vmax.f32 %v1727_v57, 0.0 }
 0x639   : > { %v1732_v62 = vmax.f32 %v1722_v59, 0.0  ;;  %2326 = vmatprep.subr.bf16.mxu1 %v2325_v60 }
 0x63a   : > { %2328 = vmatpush3.bf16.msra.mxu1 %v2325_v60 }
 0x63b   : > { %v2329_v63 = vpack.c.bf16 %v1733_v61, %v1732_v62 }
 0x63d   : > { %2330 = vmatprep.subr.bf16.mxu1 %v2329_v63 }
 0x63e   : > { %2332 = vmatpush3.bf16.msra.mxu1 %v2329_v63 }
 0x641   : > { %2271 = vmatmul.mubr.msk.f32.vlgmr.msra.gmra.mrb[0].mxu1 %vm1443_vm6, %v1735_v0 }
 0x714   : > { %v2272_v2 = vpop.f32.mrb[0].mxu1 }
 0x715   : > { %v1826_v5 = vadd.f32 %v2272_v2, %v1746_v1  ;;  %v1820_v6 = vpop.f32.mrb[1].mxu1 }
 0x716   : > { %v1821_v8 = vadd.f32 %v1820_v6, %v1741_v4 }
 0x717   : > { %v1832_v9 = vsub.f32 %v1830_v3, %v1826_v5 }
 0x718   : > { %v1831_v22 = vsub.f32 %v1829_v7, %v1821_v8 }
 0x719   : > { %v1834_v11 = vand.u32 2147483647, %v1832_v9 }
 0x71a   : > { %v1833_v16 = vand.u32 2147483647, %v1831_v22 }
 0x71b   : > { %v1836_v12 = vsel %vm1081_vm1, %v1834_v11, 0.0 }
 0x71c   : > { %v1835_v13 = vsel %vm1081_vm1, %v1833_v16, 0.0 }
 0x71d   : > { %v1837_v10 = vadd.f32 %v1836_v12, %v1835_v13 }
 0x71f   : > { %v1838_v17 = vrot.slane %v1837_v10, 4 }
 0x721   : > { %v1839_v18 = vadd.f32 %v1838_v17, %v1837_v10 }
 0x723   : > { %v1840_v19 = vrot.slane %v1839_v18, 2 }
 0x725   : > { %v1841_v20 = vadd.f32 %v1840_v19, %v1839_v18 }
 0x727   : > { %v1842_v23 = vrot.slane %v1841_v20, 1 }
 0x729   : > { %v1843_v21 = vadd.f32 %v1842_v23, %v1841_v20 }
 0x72b   : > { %1844 = vst [vmem:[%s2832_s25] sm:$0x1] %v1843_v21 }
 0x72c PF: > { %s3171_s28 = sld [smem:[#allocation13_spill]]  ;;  %s1858_s17 = sshll.u32 %s2832_s25, 4  ;;  %s1859_s17 = int_to_ptr.vmem [resolvable:$true] %s1858_s17 }
 0x72d   : > { %s3173_s27 = sld [smem:[#allocation35_spill]]  ;;  %s3174_s2 = sand.u32 1, %s2546_s30  }
 0x72e   : > { %s1846_s1 = scalar_lea.sflag [#allocation6], %s3174_s2  ;;  %s2472_s0 = scalar_lea.vmem %s1859_s17, 16 }
 0x72f   : > { %p2473_p4 = scmp.ne.s32.totalorder %s1859_s17, %s2472_s0  ;;  %s2581_s21 = smov [#allocation8]  }
 0x730   : > { %s2476_s23 = sshll.u32 %s2581_s21, 4  ;;  %s2477_s23 = int_to_ptr.vmem [resolvable:$false] %s2476_s23 }
 0x731   : > { %p2474_p5 = pnand %p2473_p4, %p2732_p3  ;;  %s2478_s22 = scalar_lea.vmem %s2477_s23, 32 }
 0x732   : > { %s2107_s18 = sshll.u32 %s3171_s28, 4  ;;  %p2479_p7 = scmp.lt.s32.totalorder %s1859_s17, %s2477_s23 }
 0x733   : > { %s3033_s4 = scalar_lea.hbm %s3173_s27, %s2107_s18  ;;  %p2475_p6 = pneg %p2474_p5 }
 0x734   : > { %p2480_p8 = scmp.lt.s32.totalorder %s2478_s22, %s2472_s0 }
 0x736   : > { %p2481_p11 = por %p2480_p8, %p2479_p7 }
 0x738   : > { %p2482_p9 = pnand %p2481_p11, %p2475_p6 }
 0x73a   : > { %2485 = shalt.err (!%p2482_p9)
}
 0x73b   : > { %s2486_s25 = scalar_lea.hbm %s3033_s4, 16  ;;  %s2490_s28 = scalar_lea.hbm %s3173_s27, 32 }
 0x73c   : > { %p2487_p10 = scmp.ne.s32.totalorder %s3033_s4, %s2486_s25  ;;  %p2491_p0 = scmp.lt.u32.totalorder %s3033_s4, %s3173_s27 }
 0x73d   : > { %p2492_p1 = scmp.lt.u32.totalorder %s2490_s28, %s2486_s25  ;;  %p2494_p4 = scmp.lt.u32.totalorder %s2486_s25, %s3033_s4 }
 0x73e   : > { %p2488_p12 = pnand %p2487_p10, %p2732_p3 }
 0x73f   : > { %p2493_p2 = por %p2492_p1, %p2491_p0 }
 0x740   : > { %p2489_p13 = pneg %p2488_p12 }
 0x741   : > { %p2495_p5 = por %p2494_p4, %p2493_p2 }
 0x743   : > { %p2496_p6 = pnand %p2495_p5, %p2489_p13 }
 0x745   : > { %2499 = shalt.err (!%p2496_p6)
}
 0x746   : > { %2339 = dma.vmem_to_hbm [thread:$0]  (%p2732_p3), %s1859_s17, 16, %s3033_s4, %s1846_s1  }
 0x747 PF: > { %s3175_s5 = sld [smem:[#allocation16_spill]]  ;;  %s3176_s2 = sld [smem:[#allocation11_spill]] }
 0x748   : > { %s3177_s0 = sld [smem:[#allocation20_spill]] }
 0x74d   : > { %p2351_p7 = scmp.ge.s32.totalorder %s3175_s5, 2  ;;  %s1870_s21 = sand.u32 1, %s3176_s2  }
 0x74e   : > { %p3178_p8 = scmp.ne.s32.totalorder %s3177_s0, 0  ;;  %s1871_s23 = scalar_lea.sflag [#allocation6], %s1870_s21 }
 0x750   : > { %p2346_p11 = pnand %p2351_p7, %p3178_p8 }
 0x752   : > { %2537 = dma.done.wait (!%p2346_p11), %s1871_s23, 16  }
 0x753   : > { %2539 = vsyncadd (!%p2346_p11), %s1871_s23, 4294967280  ;;  %s33_s23 = sadd.s32 1, %s3175_s5   ;;  %s3179_s22 = sld [smem:[#allocation12_spill]] }
 0x754   : > { %p30_p9 = scmp.ge.s32.totalorder %s33_s23, 10   ;;  %s3180_s20 = sld [smem:[#allocation21_spill]] }
 0x755   : > { %s3181_s21 = sld [smem:[#allocation14_spill]]  ;;  %s3182_s1 = sld [smem:[#allocation15_spill]] }
 0x756   : > { %s3183_s10 = sld [smem:[#allocation17_spill]]  ;;  %s3184_s2 = sld [smem:[#allocation19_spill]] }
 0x757   : > { %s3185_s0 = smov %s2546_s30  ;;  %32 = sbr.rel (!%p30_p9) target bundleno = 20 (0x14), region = 179 }
 0x759   : > { %s3186_s30 = smov %s3179_s22 }
 0x75c   : > { %s3187_s22 = smov %s3183_s10 }
 0x75e   :  { %1875 = vsyncpa [#allocation6], 1 }
 0x75f   :  { %1877 = vsyncpa [#allocation6 + $0x1], 1 }
 0x760   :  { %1878 = vsyncpa [#allocation7], 1 }
 0x761   :  { %1880 = vsyncpa [#allocation7 + $0x1], 1 }

</bundles_post_ra>
